<compile_context>
chip_gen: v7x
topology: tpu7x:2x2x1
jax: 0.10.0
libtpu: 0.0.40
codegen_flags: <defaults>
</compile_context>

<pallas_src>
import jax
import jax.numpy as jnp
from jax.experimental import pallas as pl
from jax.experimental.pallas import tpu as pltpu


def _leaky(x):
    return jnp.where(x >= 0, x, 0.1 * x)


# ----------------------------------------------------------------------------
# Single fused forward kernel.  No grid: everything fits trivially in VMEM
# (adj 48 KiB + weights/activations < ~150 KiB fp32).
# ----------------------------------------------------------------------------
def _fused_forward_kernel(
    x_ref, acat_ref,
    w1_ref, r1_ref, b1_ref, s1_ref, t1_ref,        # conv1 rel-W, root, bias, bn scale, bn shift
    w2_ref, r2_ref, b2_ref, s2_ref, t2_ref,        # conv2 + bn2
    w3_ref, r3_ref, b3_ref,                        # conv3
    aw1_ref, ab1_ref, aw2_ref, ab2_ref,            # attention MLP
    bmat_ref, bmatT_ref,                           # (G, N), (N, G)
    cwa_ref, cwb_ref, cb1_ref, cw2_ref, cb2_ref,   # combiner MLP (first weight split in halves)
    o_ref,
):
    f32 = jnp.float32
    x = x_ref[...]
    acat = acat_ref[...]                           # (N, R*N)

    def rgcn(h, w_ref, root_ref, b_ref):
        # self/root term
        acc = jnp.dot(h, root_ref[...], preferred_element_type=f32) + b_ref[...]
        # relation term as ONE wide-K matmul:
        #   sum_r A[r] @ (h @ W[r]) == A_cat @ vstack_r(h @ W[r])
        R = w_ref.shape[0]
        z = jnp.concatenate(
            [jnp.dot(h, w_ref[r], preferred_element_type=f32) for r in range(R)],
            axis=0,
        )                                          # (R*N, H)
        return acc + jnp.dot(acat, z, preferred_element_type=f32)

    # layer 1 + BN + LeakyReLU  (dropout = identity in eval mode)
    h = rgcn(x, w1_ref, r1_ref, b1_ref)
    h = _leaky(h * s1_ref[...] + t1_ref[...])
    # layer 2 + BN + LeakyReLU
    h = rgcn(h, w2_ref, r2_ref, b2_ref)
    h = _leaky(h * s2_ref[...] + t2_ref[...])
    # layer 3 -> node embeddings
    node_emb = rgcn(h, w3_ref, r3_ref, b3_ref)     # (N, H)

    # attention pooling: scores MLP, softmax over ALL nodes (dim=0, matching PyTorch),
    # per-graph weighted sum via one-hot membership matmul, then expand back to nodes.
    a = _leaky(jnp.dot(node_emb, aw1_ref[...], preferred_element_type=f32) + ab1_ref[...])
    s = jnp.dot(a, aw2_ref[...], preferred_element_type=f32) + ab2_ref[...]        # (N, 1)
    m = jnp.max(s, axis=0, keepdims=True)
    e = jnp.exp(s - m)
    wts = e * pl.reciprocal(jnp.sum(e, axis=0, keepdims=True), approx=True)
    weighted = node_emb * wts                                                      # (N, H)
    g = jnp.dot(bmat_ref[...], weighted, preferred_element_type=f32)               # (G, H)
    expanded = jnp.dot(bmatT_ref[...], g, preferred_element_type=f32)              # (N, H)

    # combiner MLP on cat([node_emb, expanded]) -- concat expressed as split weight.
    c = (
        jnp.dot(node_emb, cwa_ref[...], preferred_element_type=f32)
        + jnp.dot(expanded, cwb_ref[...], preferred_element_type=f32)
        + cb1_ref[...]
    )
    c = _leaky(c)
    out = jnp.dot(c, cw2_ref[...], preferred_element_type=f32) + cb2_ref[...]      # (N, D)

    # row L2 normalize: out / max(||out||, 1e-12)   (F.normalize semantics)
    sumsq = jnp.sum(out * out, axis=1, keepdims=True)
    o_ref[...] = out * jax.lax.rsqrt(jnp.maximum(sumsq, 1e-24))


@jax.jit
def graph_pool_rgcn_forward(params, x, adj, bmat):
    p = params
    R, N, _ = adj.shape
    out_dim = p["comb_w2"].shape[1]
    # layout plumbing outside the kernel (cheap, traced by XLA):
    a_cat = jnp.transpose(adj, (1, 0, 2)).reshape(N, R * N)   # relations concatenated on columns
    bmat_T = jnp.transpose(bmat)                              # (N, G) so no in-kernel transpose

    args = (
        x, a_cat,
        p["conv1_w"], p["conv1_root"], p["conv1_b"], p["bn1_scale"], p["bn1_shift"],
        p["conv2_w"], p["conv2_root"], p["conv2_b"], p["bn2_scale"], p["bn2_shift"],
        p["conv3_w"], p["conv3_root"], p["conv3_b"],
        p["att_w1"], p["att_b1"], p["att_w2"], p["att_b2"],
        bmat, bmat_T,
        p["comb_wa"], p["comb_wb"], p["comb_b1"], p["comb_w2"], p["comb_b2"],
    )
    vmem = pl.BlockSpec(memory_space=pltpu.MemorySpace.VMEM)
    return pl.pallas_call(
        _fused_forward_kernel,
        out_shape=jax.ShapeDtypeStruct((N, out_dim), jnp.float32),
        in_specs=[vmem] * len(args),
        out_specs=vmem,
    )(*args)


# ----------------------------------------------------------------------------
# Parameter setup (deterministic, Xavier/Glorot-uniform like reset_parameters).
# ----------------------------------------------------------------------------
def _xavier(key, fan_in, fan_out):
    bound = jnp.sqrt(6.0 / (fan_in + fan_out))
    return jax.random.uniform(key, (fan_in, fan_out), jnp.float32, -bound, bound)


def init_params(key, in_dim, hidden_dim, out_dim, num_relations):
    ks = jax.random.split(key, 16)
    p = {}
    # RGCN layers (num_bases=None -> full per-relation weights)
    dims = [(in_dim, hidden_dim), (hidden_dim, hidden_dim), (hidden_dim, hidden_dim)]
    for li, (di, do) in enumerate(dims):
        wr = jnp.stack(
            [_xavier(jax.random.fold_in(ks[li], r), di, do) for r in range(num_relations)]
        )
        p[f"conv{li+1}_w"] = wr
        p[f"conv{li+1}_root"] = _xavier(ks[3 + li], di, do)
        p[f"conv{li+1}_b"] = jnp.zeros((1, do), jnp.float32)
    # BatchNorm (eval mode, fresh running stats): scale = gamma/sqrt(var+eps), shift = beta - mean*scale
    eps = 1e-5
    p["bn1_scale"] = jnp.full((1, hidden_dim), 1.0 / jnp.sqrt(1.0 + eps), jnp.float32)
    p["bn1_shift"] = jnp.zeros((1, hidden_dim), jnp.float32)
    p["bn2_scale"] = jnp.full((1, hidden_dim), 1.0 / jnp.sqrt(1.0 + eps), jnp.float32)
    p["bn2_shift"] = jnp.zeros((1, hidden_dim), jnp.float32)
    # Attention MLP
    hh = hidden_dim // 2
    p["att_w1"] = _xavier(ks[6], hidden_dim, hh)
    p["att_b1"] = jnp.zeros((1, hh), jnp.float32)
    p["att_w2"] = _xavier(ks[7], hh, 1)
    p["att_b2"] = jnp.zeros((1, 1), jnp.float32)
    # Combiner MLP: Linear(2H, H) split into two halves, then Linear(H, out)
    w_comb1 = _xavier(ks[8], 2 * hidden_dim, hidden_dim)
    p["comb_wa"] = w_comb1[:hidden_dim]
    p["comb_wb"] = w_comb1[hidden_dim:]
    p["comb_b1"] = jnp.zeros((1, hidden_dim), jnp.float32)
    p["comb_w2"] = _xavier(ks[9], hidden_dim, out_dim)
    p["comb_b2"] = jnp.zeros((1, out_dim), jnp.float32)
    return p


def build_dense_adjacency(edge_index, edge_type, num_nodes, num_relations):
    """Dense per-relation, mean-normalized adjacency A[r, tgt, src]."""
    src, tgt = edge_index[0], edge_index[1]
    adj = jnp.zeros((num_relations, num_nodes, num_nodes), jnp.float32)
    adj = adj.at[edge_type, tgt, src].add(1.0)
    deg = adj.sum(axis=-1, keepdims=True)
    return adj / jnp.maximum(deg, 1.0)


if __name__ == "__main__":
    IN_DIM, HIDDEN, OUT_DIM = 16, 32, 16
    NUM_REL, N_NODES, N_EDGES, N_GRAPHS = 3, 64, 128, 2

    key = jax.random.PRNGKey(0)
    k_x, k_src, k_tgt, k_rel, k_par = jax.random.split(key, 5)

    x = jax.random.normal(k_x, (N_NODES, IN_DIM), jnp.float32)
    src = jax.random.randint(k_src, (N_EDGES,), 0, N_NODES)
    tgt = jax.random.randint(k_tgt, (N_EDGES,), 0, N_NODES)
    edge_index = jnp.stack([src, tgt])
    edge_type = jax.random.randint(k_rel, (N_EDGES,), 0, NUM_REL)
    batch = (jnp.arange(N_NODES) >= N_NODES // 2).astype(jnp.int32)  # 2 graphs
    bmat = (batch[None, :] == jnp.arange(N_GRAPHS)[:, None]).astype(jnp.float32)

    adj = build_dense_adjacency(edge_index, edge_type, N_NODES, NUM_REL)
    params = init_params(k_par, IN_DIM, HIDDEN, OUT_DIM, NUM_REL)

    out = graph_pool_rgcn_forward(params, x, adj, bmat)
    out = jax.block_until_ready(out)
    assert out.shape == (N_NODES, OUT_DIM)
    assert bool(jnp.all(jnp.isfinite(out)))
    print("KERNEL_OK")
</pallas_src>

<mosaic_0001>
module attributes {stable_mosaic.version = 11 : i64} {
  func.func @_fused_forward_kernel(%arg0: memref<64x16xf32, #tpu.memory_space<vmem>>, %arg1: memref<64x192xf32, #tpu.memory_space<vmem>>, %arg2: memref<3x16x32xf32, #tpu.memory_space<vmem>>, %arg3: memref<16x32xf32, #tpu.memory_space<vmem>>, %arg4: memref<1x32xf32, #tpu.memory_space<vmem>>, %arg5: memref<1x32xf32, #tpu.memory_space<vmem>>, %arg6: memref<1x32xf32, #tpu.memory_space<vmem>>, %arg7: memref<3x32x32xf32, #tpu.memory_space<vmem>>, %arg8: memref<32x32xf32, #tpu.memory_space<vmem>>, %arg9: memref<1x32xf32, #tpu.memory_space<vmem>>, %arg10: memref<1x32xf32, #tpu.memory_space<vmem>>, %arg11: memref<1x32xf32, #tpu.memory_space<vmem>>, %arg12: memref<3x32x32xf32, #tpu.memory_space<vmem>>, %arg13: memref<32x32xf32, #tpu.memory_space<vmem>>, %arg14: memref<1x32xf32, #tpu.memory_space<vmem>>, %arg15: memref<32x16xf32, #tpu.memory_space<vmem>>, %arg16: memref<1x16xf32, #tpu.memory_space<vmem>>, %arg17: memref<16x1xf32, #tpu.memory_space<vmem>>, %arg18: memref<1x1xf32, #tpu.memory_space<vmem>>, %arg19: memref<2x64xf32, #tpu.memory_space<vmem>>, %arg20: memref<64x2xf32, #tpu.memory_space<vmem>>, %arg21: memref<32x32xf32, #tpu.memory_space<vmem>>, %arg22: memref<32x32xf32, #tpu.memory_space<vmem>>, %arg23: memref<1x32xf32, #tpu.memory_space<vmem>>, %arg24: memref<32x16xf32, #tpu.memory_space<vmem>>, %arg25: memref<1x16xf32, #tpu.memory_space<vmem>>, %arg26: memref<64x16xf32, #tpu.memory_space<vmem>>) attributes {dimension_semantics = [], scalar_prefetch = 0 : i64, scratch_operands = 0 : i64, tpu.core_type = #tpu.core_type<tc>} {
    %c0 = arith.constant 0 : index
    %c0_0 = arith.constant 0 : index
    %0 = vector.load %arg0[%c0, %c0_0] : memref<64x16xf32, #tpu.memory_space<vmem>>, vector<64x16xf32>
    %c0_1 = arith.constant 0 : index
    %c0_2 = arith.constant 0 : index
    %1 = vector.load %arg1[%c0_1, %c0_2] : memref<64x192xf32, #tpu.memory_space<vmem>>, vector<64x192xf32>
    %c0_3 = arith.constant 0 : index
    %c0_4 = arith.constant 0 : index
    %2 = vector.load %arg3[%c0_3, %c0_4] : memref<16x32xf32, #tpu.memory_space<vmem>>, vector<16x32xf32>
    %cst = arith.constant dense<0.000000e+00> : vector<64x32xf32>
    %3 = tpu.matmul %0, %2, %cst {dimension_numbers = #tpu.dot_dimension_numbers<[1], [0], [0], [1], [0, 0, 1, 1], [], []>} : vector<64x16xf32>, vector<16x32xf32>, vector<64x32xf32> -> vector<64x32xf32>
    %c0_5 = arith.constant 0 : index
    %c0_6 = arith.constant 0 : index
    %4 = vector.load %arg4[%c0_5, %c0_6] : memref<1x32xf32, #tpu.memory_space<vmem>>, vector<1x32xf32>
    %5 = vector.broadcast %4 : vector<1x32xf32> to vector<64x32xf32>
    %6 = arith.addf %3, %5 : vector<64x32xf32>
    %c0_7 = arith.constant 0 : index
    %c0_8 = arith.constant 0 : index
    %c0_9 = arith.constant 0 : index
    %7 = vector.load %arg2[%c0_7, %c0_8, %c0_9] : memref<3x16x32xf32, #tpu.memory_space<vmem>>, vector<1x16x32xf32>
    %8 = vector.shape_cast %7 : vector<1x16x32xf32> to vector<16x32xf32>
    %cst_10 = arith.constant dense<0.000000e+00> : vector<64x32xf32>
    %9 = tpu.matmul %0, %8, %cst_10 {dimension_numbers = #tpu.dot_dimension_numbers<[1], [0], [0], [1], [0, 0, 1, 1], [], []>} : vector<64x16xf32>, vector<16x32xf32>, vector<64x32xf32> -> vector<64x32xf32>
    %c1 = arith.constant 1 : index
    %c0_11 = arith.constant 0 : index
    %c0_12 = arith.constant 0 : index
    %10 = vector.load %arg2[%c1, %c0_11, %c0_12] : memref<3x16x32xf32, #tpu.memory_space<vmem>>, vector<1x16x32xf32>
    %11 = vector.shape_cast %10 : vector<1x16x32xf32> to vector<16x32xf32>
    %cst_13 = arith.constant dense<0.000000e+00> : vector<64x32xf32>
    %12 = tpu.matmul %0, %11, %cst_13 {dimension_numbers = #tpu.dot_dimension_numbers<[1], [0], [0], [1], [0, 0, 1, 1], [], []>} : vector<64x16xf32>, vector<16x32xf32>, vector<64x32xf32> -> vector<64x32xf32>
    %c2 = arith.constant 2 : index
    %c0_14 = arith.constant 0 : index
    %c0_15 = arith.constant 0 : index
    %13 = vector.load %arg2[%c2, %c0_14, %c0_15] : memref<3x16x32xf32, #tpu.memory_space<vmem>>, vector<1x16x32xf32>
    %14 = vector.shape_cast %13 : vector<1x16x32xf32> to vector<16x32xf32>
    %cst_16 = arith.constant dense<0.000000e+00> : vector<64x32xf32>
    %15 = tpu.matmul %0, %14, %cst_16 {dimension_numbers = #tpu.dot_dimension_numbers<[1], [0], [0], [1], [0, 0, 1, 1], [], []>} : vector<64x16xf32>, vector<16x32xf32>, vector<64x32xf32> -> vector<64x32xf32>
    %16 = tpu.concatenate %9, %12, %15 in 0 : vector<64x32xf32>, vector<64x32xf32>, vector<64x32xf32> -> vector<192x32xf32>
    %cst_17 = arith.constant dense<0.000000e+00> : vector<64x32xf32>
    %17 = tpu.matmul %1, %16, %cst_17 {dimension_numbers = #tpu.dot_dimension_numbers<[1], [0], [0], [1], [0, 0, 1, 1], [], []>} : vector<64x192xf32>, vector<192x32xf32>, vector<64x32xf32> -> vector<64x32xf32>
    %18 = arith.addf %6, %17 : vector<64x32xf32>
    %c0_18 = arith.constant 0 : index
    %c0_19 = arith.constant 0 : index
    %19 = vector.load %arg5[%c0_18, %c0_19] : memref<1x32xf32, #tpu.memory_space<vmem>>, vector<1x32xf32>
    %20 = vector.broadcast %19 : vector<1x32xf32> to vector<64x32xf32>
    %21 = arith.mulf %18, %20 : vector<64x32xf32>
    %c0_20 = arith.constant 0 : index
    %c0_21 = arith.constant 0 : index
    %22 = vector.load %arg6[%c0_20, %c0_21] : memref<1x32xf32, #tpu.memory_space<vmem>>, vector<1x32xf32>
    %23 = vector.broadcast %22 : vector<1x32xf32> to vector<64x32xf32>
    %24 = arith.addf %21, %23 : vector<64x32xf32>
    %cst_22 = arith.constant 0.000000e+00 : f32
    %25 = vector.broadcast %cst_22 : f32 to vector<64x32xf32>
    %26 = arith.cmpf oge, %24, %25 : vector<64x32xf32>
    %cst_23 = arith.constant 1.000000e-01 : f32
    %27 = vector.broadcast %cst_23 : f32 to vector<64x32xf32>
    %28 = arith.mulf %27, %24 : vector<64x32xf32>
    %29 = arith.select %26, %24, %28 : vector<64x32xi1>, vector<64x32xf32>
    %c0_24 = arith.constant 0 : index
    %c0_25 = arith.constant 0 : index
    %30 = vector.load %arg8[%c0_24, %c0_25] : memref<32x32xf32, #tpu.memory_space<vmem>>, vector<32x32xf32>
    %cst_26 = arith.constant dense<0.000000e+00> : vector<64x32xf32>
    %31 = tpu.matmul %29, %30, %cst_26 {dimension_numbers = #tpu.dot_dimension_numbers<[1], [0], [0], [1], [0, 0, 1, 1], [], []>} : vector<64x32xf32>, vector<32x32xf32>, vector<64x32xf32> -> vector<64x32xf32>
    %c0_27 = arith.constant 0 : index
    %c0_28 = arith.constant 0 : index
    %32 = vector.load %arg9[%c0_27, %c0_28] : memref<1x32xf32, #tpu.memory_space<vmem>>, vector<1x32xf32>
    %33 = vector.broadcast %32 : vector<1x32xf32> to vector<64x32xf32>
    %34 = arith.addf %31, %33 : vector<64x32xf32>
    %c0_29 = arith.constant 0 : index
    %c0_30 = arith.constant 0 : index
    %c0_31 = arith.constant 0 : index
    %35 = vector.load %arg7[%c0_29, %c0_30, %c0_31] : memref<3x32x32xf32, #tpu.memory_space<vmem>>, vector<1x32x32xf32>
    %36 = vector.shape_cast %35 : vector<1x32x32xf32> to vector<32x32xf32>
    %cst_32 = arith.constant dense<0.000000e+00> : vector<64x32xf32>
    %37 = tpu.matmul %29, %36, %cst_32 {dimension_numbers = #tpu.dot_dimension_numbers<[1], [0], [0], [1], [0, 0, 1, 1], [], []>} : vector<64x32xf32>, vector<32x32xf32>, vector<64x32xf32> -> vector<64x32xf32>
    %c1_33 = arith.constant 1 : index
    %c0_34 = arith.constant 0 : index
    %c0_35 = arith.constant 0 : index
    %38 = vector.load %arg7[%c1_33, %c0_34, %c0_35] : memref<3x32x32xf32, #tpu.memory_space<vmem>>, vector<1x32x32xf32>
    %39 = vector.shape_cast %38 : vector<1x32x32xf32> to vector<32x32xf32>
    %cst_36 = arith.constant dense<0.000000e+00> : vector<64x32xf32>
    %40 = tpu.matmul %29, %39, %cst_36 {dimension_numbers = #tpu.dot_dimension_numbers<[1], [0], [0], [1], [0, 0, 1, 1], [], []>} : vector<64x32xf32>, vector<32x32xf32>, vector<64x32xf32> -> vector<64x32xf32>
    %c2_37 = arith.constant 2 : index
    %c0_38 = arith.constant 0 : index
    %c0_39 = arith.constant 0 : index
    %41 = vector.load %arg7[%c2_37, %c0_38, %c0_39] : memref<3x32x32xf32, #tpu.memory_space<vmem>>, vector<1x32x32xf32>
    %42 = vector.shape_cast %41 : vector<1x32x32xf32> to vector<32x32xf32>
    %cst_40 = arith.constant dense<0.000000e+00> : vector<64x32xf32>
    %43 = tpu.matmul %29, %42, %cst_40 {dimension_numbers = #tpu.dot_dimension_numbers<[1], [0], [0], [1], [0, 0, 1, 1], [], []>} : vector<64x32xf32>, vector<32x32xf32>, vector<64x32xf32> -> vector<64x32xf32>
    %44 = tpu.concatenate %37, %40, %43 in 0 : vector<64x32xf32>, vector<64x32xf32>, vector<64x32xf32> -> vector<192x32xf32>
    %cst_41 = arith.constant dense<0.000000e+00> : vector<64x32xf32>
    %45 = tpu.matmul %1, %44, %cst_41 {dimension_numbers = #tpu.dot_dimension_numbers<[1], [0], [0], [1], [0, 0, 1, 1], [], []>} : vector<64x192xf32>, vector<192x32xf32>, vector<64x32xf32> -> vector<64x32xf32>
    %46 = arith.addf %34, %45 : vector<64x32xf32>
    %c0_42 = arith.constant 0 : index
    %c0_43 = arith.constant 0 : index
    %47 = vector.load %arg10[%c0_42, %c0_43] : memref<1x32xf32, #tpu.memory_space<vmem>>, vector<1x32xf32>
    %48 = vector.broadcast %47 : vector<1x32xf32> to vector<64x32xf32>
    %49 = arith.mulf %46, %48 : vector<64x32xf32>
    %c0_44 = arith.constant 0 : index
    %c0_45 = arith.constant 0 : index
    %50 = vector.load %arg11[%c0_44, %c0_45] : memref<1x32xf32, #tpu.memory_space<vmem>>, vector<1x32xf32>
    %51 = vector.broadcast %50 : vector<1x32xf32> to vector<64x32xf32>
    %52 = arith.addf %49, %51 : vector<64x32xf32>
    %cst_46 = arith.constant 0.000000e+00 : f32
    %53 = vector.broadcast %cst_46 : f32 to vector<64x32xf32>
    %54 = arith.cmpf oge, %52, %53 : vector<64x32xf32>
    %cst_47 = arith.constant 1.000000e-01 : f32
    %55 = vector.broadcast %cst_47 : f32 to vector<64x32xf32>
    %56 = arith.mulf %55, %52 : vector<64x32xf32>
    %57 = arith.select %54, %52, %56 : vector<64x32xi1>, vector<64x32xf32>
    %c0_48 = arith.constant 0 : index
    %c0_49 = arith.constant 0 : index
    %58 = vector.load %arg13[%c0_48, %c0_49] : memref<32x32xf32, #tpu.memory_space<vmem>>, vector<32x32xf32>
    %cst_50 = arith.constant dense<0.000000e+00> : vector<64x32xf32>
    %59 = tpu.matmul %57, %58, %cst_50 {dimension_numbers = #tpu.dot_dimension_numbers<[1], [0], [0], [1], [0, 0, 1, 1], [], []>} : vector<64x32xf32>, vector<32x32xf32>, vector<64x32xf32> -> vector<64x32xf32>
    %c0_51 = arith.constant 0 : index
    %c0_52 = arith.constant 0 : index
    %60 = vector.load %arg14[%c0_51, %c0_52] : memref<1x32xf32, #tpu.memory_space<vmem>>, vector<1x32xf32>
    %61 = vector.broadcast %60 : vector<1x32xf32> to vector<64x32xf32>
    %62 = arith.addf %59, %61 : vector<64x32xf32>
    %c0_53 = arith.constant 0 : index
    %c0_54 = arith.constant 0 : index
    %c0_55 = arith.constant 0 : index
    %63 = vector.load %arg12[%c0_53, %c0_54, %c0_55] : memref<3x32x32xf32, #tpu.memory_space<vmem>>, vector<1x32x32xf32>
    %64 = vector.shape_cast %63 : vector<1x32x32xf32> to vector<32x32xf32>
    %cst_56 = arith.constant dense<0.000000e+00> : vector<64x32xf32>
    %65 = tpu.matmul %57, %64, %cst_56 {dimension_numbers = #tpu.dot_dimension_numbers<[1], [0], [0], [1], [0, 0, 1, 1], [], []>} : vector<64x32xf32>, vector<32x32xf32>, vector<64x32xf32> -> vector<64x32xf32>
    %c1_57 = arith.constant 1 : index
    %c0_58 = arith.constant 0 : index
    %c0_59 = arith.constant 0 : index
    %66 = vector.load %arg12[%c1_57, %c0_58, %c0_59] : memref<3x32x32xf32, #tpu.memory_space<vmem>>, vector<1x32x32xf32>
    %67 = vector.shape_cast %66 : vector<1x32x32xf32> to vector<32x32xf32>
    %cst_60 = arith.constant dense<0.000000e+00> : vector<64x32xf32>
    %68 = tpu.matmul %57, %67, %cst_60 {dimension_numbers = #tpu.dot_dimension_numbers<[1], [0], [0], [1], [0, 0, 1, 1], [], []>} : vector<64x32xf32>, vector<32x32xf32>, vector<64x32xf32> -> vector<64x32xf32>
    %c2_61 = arith.constant 2 : index
    %c0_62 = arith.constant 0 : index
    %c0_63 = arith.constant 0 : index
    %69 = vector.load %arg12[%c2_61, %c0_62, %c0_63] : memref<3x32x32xf32, #tpu.memory_space<vmem>>, vector<1x32x32xf32>
    %70 = vector.shape_cast %69 : vector<1x32x32xf32> to vector<32x32xf32>
    %cst_64 = arith.constant dense<0.000000e+00> : vector<64x32xf32>
    %71 = tpu.matmul %57, %70, %cst_64 {dimension_numbers = #tpu.dot_dimension_numbers<[1], [0], [0], [1], [0, 0, 1, 1], [], []>} : vector<64x32xf32>, vector<32x32xf32>, vector<64x32xf32> -> vector<64x32xf32>
    %72 = tpu.concatenate %65, %68, %71 in 0 : vector<64x32xf32>, vector<64x32xf32>, vector<64x32xf32> -> vector<192x32xf32>
    %cst_65 = arith.constant dense<0.000000e+00> : vector<64x32xf32>
    %73 = tpu.matmul %1, %72, %cst_65 {dimension_numbers = #tpu.dot_dimension_numbers<[1], [0], [0], [1], [0, 0, 1, 1], [], []>} : vector<64x192xf32>, vector<192x32xf32>, vector<64x32xf32> -> vector<64x32xf32>
    %74 = arith.addf %62, %73 : vector<64x32xf32>
    %c0_66 = arith.constant 0 : index
    %c0_67 = arith.constant 0 : index
    %75 = vector.load %arg15[%c0_66, %c0_67] : memref<32x16xf32, #tpu.memory_space<vmem>>, vector<32x16xf32>
    %cst_68 = arith.constant dense<0.000000e+00> : vector<64x16xf32>
    %76 = tpu.matmul %74, %75, %cst_68 {dimension_numbers = #tpu.dot_dimension_numbers<[1], [0], [0], [1], [0, 0, 1, 1], [], []>} : vector<64x32xf32>, vector<32x16xf32>, vector<64x16xf32> -> vector<64x16xf32>
    %c0_69 = arith.constant 0 : index
    %c0_70 = arith.constant 0 : index
    %77 = vector.load %arg16[%c0_69, %c0_70] : memref<1x16xf32, #tpu.memory_space<vmem>>, vector<1x16xf32>
    %78 = vector.broadcast %77 : vector<1x16xf32> to vector<64x16xf32>
    %79 = arith.addf %76, %78 : vector<64x16xf32>
    %cst_71 = arith.constant 0.000000e+00 : f32
    %80 = vector.broadcast %cst_71 : f32 to vector<64x16xf32>
    %81 = arith.cmpf oge, %79, %80 : vector<64x16xf32>
    %cst_72 = arith.constant 1.000000e-01 : f32
    %82 = vector.broadcast %cst_72 : f32 to vector<64x16xf32>
    %83 = arith.mulf %82, %79 : vector<64x16xf32>
    %84 = arith.select %81, %79, %83 : vector<64x16xi1>, vector<64x16xf32>
    %c0_73 = arith.constant 0 : index
    %c0_74 = arith.constant 0 : index
    %85 = vector.load %arg17[%c0_73, %c0_74] : memref<16x1xf32, #tpu.memory_space<vmem>>, vector<16x1xf32>
    %cst_75 = arith.constant dense<0.000000e+00> : vector<64x1xf32>
    %86 = tpu.matmul %84, %85, %cst_75 {dimension_numbers = #tpu.dot_dimension_numbers<[1], [0], [0], [1], [0, 0, 1, 1], [], []>} : vector<64x16xf32>, vector<16x1xf32>, vector<64x1xf32> -> vector<64x1xf32>
    %c0_76 = arith.constant 0 : index
    %c0_77 = arith.constant 0 : index
    %87 = vector.load %arg18[%c0_76, %c0_77] : memref<1x1xf32, #tpu.memory_space<vmem>>, vector<1x1xf32>
    %88 = vector.broadcast %87 : vector<1x1xf32> to vector<64x1xf32>
    %89 = arith.addf %86, %88 : vector<64x1xf32>
    %cst_78 = arith.constant dense<0xFF800000> : vector<1xf32>
    %90 = vector.multi_reduction <maximumf>, %89, %cst_78 [0] : vector<64x1xf32> to vector<1xf32>
    %91 = vector.shape_cast %90 : vector<1xf32> to vector<1x1xf32>
    %92 = vector.broadcast %91 : vector<1x1xf32> to vector<64x1xf32>
    %93 = arith.subf %89, %92 : vector<64x1xf32>
    %94 = math.exp %93 : vector<64x1xf32>
    %cst_79 = arith.constant dense<0.000000e+00> : vector<1xf32>
    %95 = vector.multi_reduction <add>, %94, %cst_79 [0] : vector<64x1xf32> to vector<1xf32>
    %96 = vector.shape_cast %95 : vector<1xf32> to vector<1x1xf32>
    %97 = tpu.reciprocal %96 {approx = true} : vector<1x1xf32> -> vector<1x1xf32>
    %98 = vector.broadcast %97 : vector<1x1xf32> to vector<64x1xf32>
    %99 = arith.mulf %94, %98 : vector<64x1xf32>
    %100 = vector.broadcast %99 : vector<64x1xf32> to vector<64x32xf32>
    %101 = arith.mulf %74, %100 : vector<64x32xf32>
    %c0_80 = arith.constant 0 : index
    %c0_81 = arith.constant 0 : index
    %102 = vector.load %arg19[%c0_80, %c0_81] : memref<2x64xf32, #tpu.memory_space<vmem>>, vector<2x64xf32>
    %cst_82 = arith.constant dense<0.000000e+00> : vector<2x32xf32>
    %103 = tpu.matmul %102, %101, %cst_82 {dimension_numbers = #tpu.dot_dimension_numbers<[1], [0], [0], [1], [0, 0, 1, 1], [], []>} : vector<2x64xf32>, vector<64x32xf32>, vector<2x32xf32> -> vector<2x32xf32>
    %c0_83 = arith.constant 0 : index
    %c0_84 = arith.constant 0 : index
    %104 = vector.load %arg20[%c0_83, %c0_84] : memref<64x2xf32, #tpu.memory_space<vmem>>, vector<64x2xf32>
    %cst_85 = arith.constant dense<0.000000e+00> : vector<64x32xf32>
    %105 = tpu.matmul %104, %103, %cst_85 {dimension_numbers = #tpu.dot_dimension_numbers<[1], [0], [0], [1], [0, 0, 1, 1], [], []>} : vector<64x2xf32>, vector<2x32xf32>, vector<64x32xf32> -> vector<64x32xf32>
    %c0_86 = arith.constant 0 : index
    %c0_87 = arith.constant 0 : index
    %106 = vector.load %arg21[%c0_86, %c0_87] : memref<32x32xf32, #tpu.memory_space<vmem>>, vector<32x32xf32>
    %cst_88 = arith.constant dense<0.000000e+00> : vector<64x32xf32>
    %107 = tpu.matmul %74, %106, %cst_88 {dimension_numbers = #tpu.dot_dimension_numbers<[1], [0], [0], [1], [0, 0, 1, 1], [], []>} : vector<64x32xf32>, vector<32x32xf32>, vector<64x32xf32> -> vector<64x32xf32>
    %c0_89 = arith.constant 0 : index
    %c0_90 = arith.constant 0 : index
    %108 = vector.load %arg22[%c0_89, %c0_90] : memref<32x32xf32, #tpu.memory_space<vmem>>, vector<32x32xf32>
    %cst_91 = arith.constant dense<0.000000e+00> : vector<64x32xf32>
    %109 = tpu.matmul %105, %108, %cst_91 {dimension_numbers = #tpu.dot_dimension_numbers<[1], [0], [0], [1], [0, 0, 1, 1], [], []>} : vector<64x32xf32>, vector<32x32xf32>, vector<64x32xf32> -> vector<64x32xf32>
    %110 = arith.addf %107, %109 : vector<64x32xf32>
    %c0_92 = arith.constant 0 : index
    %c0_93 = arith.constant 0 : index
    %111 = vector.load %arg23[%c0_92, %c0_93] : memref<1x32xf32, #tpu.memory_space<vmem>>, vector<1x32xf32>
    %112 = vector.broadcast %111 : vector<1x32xf32> to vector<64x32xf32>
    %113 = arith.addf %110, %112 : vector<64x32xf32>
    %cst_94 = arith.constant 0.000000e+00 : f32
    %114 = vector.broadcast %cst_94 : f32 to vector<64x32xf32>
    %115 = arith.cmpf oge, %113, %114 : vector<64x32xf32>
    %cst_95 = arith.constant 1.000000e-01 : f32
    %116 = vector.broadcast %cst_95 : f32 to vector<64x32xf32>
    %117 = arith.mulf %116, %113 : vector<64x32xf32>
    %118 = arith.select %115, %113, %117 : vector<64x32xi1>, vector<64x32xf32>
    %c0_96 = arith.constant 0 : index
    %c0_97 = arith.constant 0 : index
    %119 = vector.load %arg24[%c0_96, %c0_97] : memref<32x16xf32, #tpu.memory_space<vmem>>, vector<32x16xf32>
    %cst_98 = arith.constant dense<0.000000e+00> : vector<64x16xf32>
    %120 = tpu.matmul %118, %119, %cst_98 {dimension_numbers = #tpu.dot_dimension_numbers<[1], [0], [0], [1], [0, 0, 1, 1], [], []>} : vector<64x32xf32>, vector<32x16xf32>, vector<64x16xf32> -> vector<64x16xf32>
    %c0_99 = arith.constant 0 : index
    %c0_100 = arith.constant 0 : index
    %121 = vector.load %arg25[%c0_99, %c0_100] : memref<1x16xf32, #tpu.memory_space<vmem>>, vector<1x16xf32>
    %122 = vector.broadcast %121 : vector<1x16xf32> to vector<64x16xf32>
    %123 = arith.addf %120, %122 : vector<64x16xf32>
    %124 = arith.mulf %123, %123 : vector<64x16xf32>
    %cst_101 = arith.constant dense<0.000000e+00> : vector<64xf32>
    %125 = vector.multi_reduction <add>, %124, %cst_101 [1] : vector<64x16xf32> to vector<64xf32>
    %126 = vector.shape_cast %125 : vector<64xf32> to vector<64x1xf32>
    %cst_102 = arith.constant 1.000000e-24 : f32
    %127 = vector.broadcast %cst_102 : f32 to vector<64x1xf32>
    %128 = arith.maximumf %126, %127 : vector<64x1xf32>
    %129 = math.rsqrt %128 : vector<64x1xf32>
    %130 = vector.broadcast %129 : vector<64x1xf32> to vector<64x16xf32>
    %131 = arith.mulf %123, %130 : vector<64x16xf32>
    %c0_103 = arith.constant 0 : index
    %c0_104 = arith.constant 0 : index
    %132 = vector.load %arg26[%c0_103, %c0_104] : memref<64x16xf32, #tpu.memory_space<vmem>>, vector<64x16xf32>
    tpu.vector_store %arg26[%c0_103, %c0_104], %131 {strides = array<i32>} : memref<64x16xf32, #tpu.memory_space<vmem>>, vector<64x16xf32>,
    return
  }
}

</mosaic_0001>

<bundles_post_ra>
// kernel: graph_pool_rgcn_forward.1
= control target key start
LH: loop header
LB: loop body
LE: loop exit
PB: predicated region body
PF: predicated region fallthrough
CT: control target
= control target key end

     0   :  { %vm118_vm0 = vcmask 130048   ;;  %v4165_v20 = vmov 0.0|0.0   ;;  %vm571_vm1 = vcmask 523264   ;;  %vm774_vm3 = vcmask 261120   ;;  %s5184_s3 = inlined_call_operand.vmem [shape: f32[16,32], index: 3, kind: input, shape index: {}]   ;;  %s5185_s0 = inlined_call_operand.vmem [shape: f32[64,16], index: 0, kind: input, shape index: {}]   ;;  %s5186_s2 = inlined_call_operand.vmem [shape: f32[3,16,32], index: 2, kind: input, shape index: {}]   ;;  %s5187_s1 = inlined_call_operand.vmem [shape: f32[64,192], index: 1, kind: input, shape index: {}]   ;;  %s5188_s8 = inlined_call_operand.vmem [shape: f32[32,32], index: 8, kind: input, shape index: {}]   ;;  %s5189_s7 = inlined_call_operand.vmem [shape: f32[3,32,32], index: 7, kind: input, shape index: {}]   ;;  %s5190_s4 = inlined_call_operand.vmem [shape: f32[1,32], index: 4, kind: input, shape index: {}]   ;;  %s5191_s5 = inlined_call_operand.vmem [shape: f32[1,32], index: 5, kind: input, shape index: {}]   ;;  %s5192_s6 = inlined_call_operand.vmem [shape: f32[1,32], index: 6, kind: input, shape index: {}]   ;;  %s5193_s13 = inlined_call_operand.vmem [shape: f32[32,32], index: 13, kind: input, shape index: {}]   ;;  %s5194_s12 = inlined_call_operand.vmem [shape: f32[3,32,32], index: 12, kind: input, shape index: {}]   ;;  %s5195_s9 = inlined_call_operand.vmem [shape: f32[1,32], index: 9, kind: input, shape index: {}]   ;;  %s5196_s10 = inlined_call_operand.vmem [shape: f32[1,32], index: 10, kind: input, shape index: {}]   ;;  %s5197_s11 = inlined_call_operand.vmem [shape: f32[1,32], index: 11, kind: input, shape index: {}]   ;;  %s5198_s15 = inlined_call_operand.vmem [shape: f32[32,16], index: 15, kind: input, shape index: {}]   ;;  %s5199_s14 = inlined_call_operand.vmem [shape: f32[1,32], index: 14, kind: input, shape index: {}]   ;;  %s5200_s17 = inlined_call_operand.vmem [shape: f32[16,1], index: 17, kind: input, shape index: {}]   ;;  %s5201_s18 = inlined_call_operand.<no memory space> [shape: f32[1,1], index: 18, kind: input, shape index: {}]   ;;  %s5202_s16 = inlined_call_operand.vmem [shape: f32[1,16], index: 16, kind: input, shape index: {}]   ;;  %s5203_s19 = inlined_call_operand.vmem [shape: f32[2,64], index: 19, kind: input, shape index: {}]   ;;  %s5204_s20 = inlined_call_operand.vmem [shape: f32[64,2], index: 20, kind: input, shape index: {}]   ;;  %s5205_s22 = inlined_call_operand.vmem [shape: f32[32,32], index: 22, kind: input, shape index: {}]   ;;  %s5206_s21 = inlined_call_operand.vmem [shape: f32[32,32], index: 21, kind: input, shape index: {}]   ;;  %s5207_s24 = inlined_call_operand.vmem [shape: f32[32,16], index: 24, kind: input, shape index: {}]   ;;  %s5208_s23 = inlined_call_operand.vmem [shape: f32[1,32], index: 23, kind: input, shape index: {}]   ;;  %s5209_s25 = inlined_call_operand.vmem [shape: f32[1,16], index: 25, kind: input, shape index: {}]   ;;  %s5210_s26 = inlined_call_operand.vmem [shape: f32[64,16], index: 26, kind: output, shape index: {}]  }
   0x1   :  { %5219 = sst [smem:[#allocation3_spill]] %s5184_s3 }
   0x2   :  { %5220 = sst [smem:[#allocation4_spill]] %s5185_s0 }
   0x3   :  { %5221 = sst [smem:[#allocation5_spill]] %s5186_s2  ;;  %s5231_s2 = sld [smem:[#allocation4_spill]] }
   0x4   :  { %5222 = sst [smem:[#allocation6_spill]] %s5187_s1  ;;  %s5232_s3 = sld [smem:[#allocation5_spill]] }
   0x5   :  { %5223 = sst [smem:[#allocation7_spill]] %s5188_s8 }
   0x6   :  { %5224 = sst [smem:[#allocation8_spill]] %s5189_s7  ;;  %s5234_s0 = sld [smem:[#allocation7_spill]] }
   0x7   :  { %5225 = sst [smem:[#allocation9_spill]] %s5190_s4 }
   0x8   :  { %5226 = sst [smem:[#allocation10_spill]] %s5191_s5  ;;  %s5230_s5 = sld [smem:[#allocation3_spill]] }
   0x9   :  { %5227 = sst [smem:[#allocation11_spill]] %s5192_s6  ;;  %v85_v2 = vld [vmem:[%s5231_s2] sm:$0xff]  ;;  %v87_v7 = vld [vmem:[%s5231_s2 + $0x10] sm:$0xff]  ;;  %v86_v8 = vld [vmem:[%s5231_s2 + $0x8] sm:$0xff]  ;;  %s5236_s4 = sld [smem:[#allocation9_spill]] }
   0xa   :  { %5228 = sst [smem:[#allocation12_spill]] %s5193_s13  ;;  %3530 = vmatprep.mubr.msk.f32.mxu0 %vm118_vm0, %v85_v2  ;;  %v248_v4 = vld [vmem:[%s5232_s3] sm:$0xff]  ;;  %v249_v5 = vld [vmem:[%s5232_s3 + $0x8] sm:$0xff]  ;;  %3549 = vmatprep.mubr.msk.f32.mxu1 %vm118_vm0, %v87_v7  ;;  %v3130_v9 = vld [vmem:[%s5232_s3 + $0x10] sm:$0xff]  ;;  %s5233_s13 = sld [smem:[#allocation6_spill]] }
   0xb   :  { %5229 = sst [smem:[#allocation13_spill]] %s5194_s12  ;;  %v3883_v6 = vpack.c.bf16 %v249_v5, %v248_v4  ;;  %v3131_v10 = vld [vmem:[%s5232_s3 + $0x18] sm:$0xff]  ;;  %v3140_v11 = vld [vmem:[%s5232_s3 + $0x20] sm:$0xff]  ;;  %v3141_v13 = vld [vmem:[%s5232_s3 + $0x28] sm:$0xff]  ;;  %s5237_s3 = sld [smem:[#allocation10_spill]] }
   0xc   :  { %v3887_v12 = vpack.c.bf16 %v3131_v10, %v3130_v9  ;;  %v3891_v14 = vpack.c.bf16 %v3141_v13, %v3140_v11  ;;  %v88_v15 = vld [vmem:[%s5231_s2 + $0x18] sm:$0xff]  ;;  %v89_v16 = vld [vmem:[%s5231_s2 + $0x20] sm:$0xff]  ;;  %v90_v17 = vld [vmem:[%s5231_s2 + $0x28] sm:$0xff] }
   0xd   :  { %4115 = vmatprep.subr.bf16.mxu1 %v3883_v6  ;;  %v91_v18 = vld [vmem:[%s5231_s2 + $0x30] sm:$0xff]  ;;  %v92_v19 = vld [vmem:[%s5231_s2 + $0x38] sm:$0xff]  ;;  %s5235_s2 = sld [smem:[#allocation8_spill]] }
   0xe   :  { %v109_v0 = vld [vmem:[%s5230_s5] sm:$0xff]  ;;  %v110_v1 = vld [vmem:[%s5230_s5 + $0x8] sm:$0xff]  ;;  %4116 = vmatpush3.bf16.msra.mxu1 %v3883_v6  ;;  %s5240_s5 = sld [smem:[#allocation13_spill]] }
   0xf   :  { %v3879_v3 = vpack.c.bf16 %v110_v1, %v109_v0  ;;  %3892 = vmatprep.subr.bf16.mxu1 %v3891_v14 }
  0x10   :  { %v4388_v21 = vld [vmem:[%s5233_s13 + $0x8] sm:$0xff]  ;;  %v4436_v4 = vld [vmem:[%s5233_s13 + $0x10] sm:$0xff]  ;;  %v4475_v10 = vld [vmem:[%s5233_s13 + $0x40] sm:$0xff] }
  0x11   :  { %3880 = vmatprep.subr.bf16.mxu0 %v3879_v3  ;;  %3550 = vmatmul.mubr.msk.f32.vlgmr.msra.gmra.mrb[0].mxu1 %vm118_vm0, %v88_v15  ;;  %v4441_v5 = vld [vmem:[%s5233_s13 + $0x28] sm:$0xff]  ;;  %v4480_v11 = vld [vmem:[%s5233_s13 + $0x58] sm:$0xff] }
  0x12   :  { %3882 = vmatpush3.bf16.msra.mxu0 %v3879_v3  ;;  %3552 = vmatprep.mubr.msk.f32.mxu1 %vm118_vm0, %v89_v16  ;;  %v4427_v3 = vld [vmem:[%s5233_s13 + $0x18] sm:$0xff]  ;;  %v4467_v9 = vld [vmem:[%s5233_s13 + $0x48] sm:$0xff] }
  0x13   :  { %3884 = vmatprep.subr.bf16.mxu0 %v3883_v6  ;;  %3894 = vmatpush3.bf16.msra.mxu1 %v3891_v14  ;;  %v4493_v13 = vld [vmem:[%s5233_s13 + $0x68] sm:$0xff]  ;;  %v4501_v14 = vld [vmem:[%s5233_s13 + $0x60] sm:$0xff] }
  0x15   :  { %3531 = vmatmul.mubr.msk.f32.vlgmr.msra.gmra.mrb[0].mxu0 %vm118_vm0, %v86_v8  ;;  %3553 = vmatmul.mubr.msk.f32.gmra.mrb[2].mxu1 %vm118_vm0, %v90_v17 }
  0x16   :  { %3533 = vmatprep.mubr.msk.f32.mxu0 %vm118_vm0, %v87_v7  ;;  %3886 = vmatpush3.bf16.msra.mxu0 %v3883_v6  ;;  %v4449_v6 = vld [vmem:[%s5233_s13 + $0x20] sm:$0xff] }
  0x17   :  { %3888 = vmatprep.subr.bf16.mxu0 %v3887_v12  ;;  %3555 = vmatprep.mubr.msk.f32.mxu1 %vm118_vm0, %v91_v18 }
  0x19   :  { %3534 = vmatmul.mubr.msk.f32.gmra.mrb[2].mxu0 %vm118_vm0, %v88_v15  ;;  %3556 = vmatmul.mubr.msk.f32.gmra.mrb[4].mxu1 %vm118_vm0, %v92_v19 }
  0x1a   :  { %3536 = vmatprep.mubr.msk.f32.mxu0 %vm118_vm0, %v89_v16  ;;  %3578 = vmatprep.mubr.msk.f32.mxu1 %vm118_vm0, %v85_v2 }
  0x1d   :  { %3537 = vmatmul.mubr.msk.f32.gmra.mrb[4].mxu0 %vm118_vm0, %v90_v17  ;;  %3579 = vmatmul.mubr.msk.f32.vlgmr.msra.gmra.mrb[6].mxu1 %vm118_vm0, %v86_v8 }
  0x1e   :  { %3539 = vmatprep.mubr.msk.f32.mxu0 %vm118_vm0, %v91_v18  ;;  %3581 = vmatprep.mubr.msk.f32.mxu1 %vm118_vm0, %v87_v7 }
  0x21   :  { %3540 = vmatmul.mubr.msk.f32.gmra.mrb[6].mxu0 %vm118_vm0, %v92_v19  ;;  %3582 = vmatmul.mubr.msk.f32.gmra.mrb[8].mxu1 %vm118_vm0, %v88_v15 }
  0x22   :  { %3546 = vmatprep.mubr.msk.f32.mxu0 %vm118_vm0, %v85_v2  ;;  %3584 = vmatprep.mubr.msk.f32.mxu1 %vm118_vm0, %v89_v16 }
  0x25   :  { %3547 = vmatmul.mubr.msk.f32.vlgmr.msra.gmra.mrb[8].mxu0 %vm118_vm0, %v86_v8  ;;  %3585 = vmatmul.mubr.msk.f32.gmra.mrb[10].mxu1 %vm118_vm0, %v90_v17 }
  0x26   :  { %3890 = vmatpush3.bf16.msra.mxu0 %v3887_v12  ;;  %3562 = vmatprep.mubr.msk.f32.mxu0 %vm118_vm0, %v85_v2  ;;  %v4422_v2 = vld [vmem:[%s5233_s13] sm:$0xff]  ;;  %v4488_v12 = vld [vmem:[%s5233_s13 + $0x50] sm:$0xff] }
  0x27   :  { %3587 = vmatprep.mubr.msk.f32.mxu1 %vm118_vm0, %v91_v18  ;;  %3895 = vmatprep.subr.bf16.mxu0 %v4165_v20 }
  0x29   :  { %3563 = vmatmul.mubr.msk.f32.vlgmr.msra.gmra.mrb[10].mxu0 %vm118_vm0, %v86_v8  ;;  %3588 = vmatmul.mubr.msk.f32.gmra.mrb[12].mxu1 %vm118_vm0, %v92_v19  ;;  %v4462_v8 = vld [vmem:[%s5233_s13 + $0x30] sm:$0xff] }
  0x2a   :  { %3565 = vmatprep.mubr.msk.f32.mxu0 %vm118_vm0, %v87_v7  ;;  %v4454_v7 = vld [vmem:[%s5233_s13 + $0x38] sm:$0xff] }
  0x2d   :  { %3566 = vmatmul.mubr.msk.f32.gmra.mrb[12].mxu0 %vm118_vm0, %v88_v15  ;;  %v4506_v15 = vld [vmem:[%s5233_s13 + $0x78] sm:$0xff] }
  0x2e   :  { %3568 = vmatprep.mubr.msk.f32.mxu0 %vm118_vm0, %v89_v16  ;;  %v4514_v16 = vld [vmem:[%s5233_s13 + $0x70] sm:$0xff]  ;;  %s5238_s13 = sld [smem:[#allocation11_spill]] }
  0x31   :  { %3569 = vmatmul.mubr.msk.f32.gmra.mrb[14].mxu0 %vm118_vm0, %v90_v17  ;;  %v763_v17 = vld [vmem:[%s5234_s0] sm:$0xff] }
  0x32   :  { %3571 = vmatprep.mubr.msk.f32.mxu0 %vm118_vm0, %v91_v18  ;;  %v764_v18 = vld [vmem:[%s5234_s0 + $0x8] sm:$0xff] }
  0x35   :  { %3572 = vmatmul.mubr.msk.f32.gmra.mrb[16].mxu0 %vm118_vm0, %v92_v19  ;;  %v3931_v19 = vpack.c.bf16 %v764_v18, %v763_v17 }
  0x36   :  { %3150 = vmatprep.mubr.msk.f32.mxu0 %vm571_vm1, %v4388_v21 }
  0x37   :  { %3932 = vmatprep.subr.bf16.mxu1 %v3931_v19 }
  0x38   :  { %3934 = vmatpush3.bf16.msra.mxu1 %v3931_v19 }
  0xe4   :  { %v3551_v24 = vpop.f32.mrb[0].mxu1 }
  0xe5   :  { %v326_v25 = vpop.f32.mrb[1].mxu1 }
  0xe6   :  { %v3899_v27 = vpack.c.bf16 %v3551_v24, %v326_v25  ;;  %v765_v24 = vld [vmem:[%s5234_s0 + $0x10] sm:$0xff]  ;;  %v766_v25 = vld [vmem:[%s5234_s0 + $0x18] sm:$0xff] }
  0xe8   :  { %v4392_v22 = vpop.f32.mrb[0].mxu0  ;;  %v3554_v29 = vpop.f32.mrb[2].mxu1 }
  0xe9   :  { %v4394_v23 = vpop.f32.mrb[1].mxu0  ;;  %v336_v30 = vpop.f32.mrb[3].mxu1 }
  0xea   :  { %v3902_v32 = vpack.c.bf16 %v3554_v29, %v336_v30  ;;  %v904_v29 = vld [vmem:[%s5235_s2] sm:$0xff]  ;;  %v905_v30 = vld [vmem:[%s5235_s2 + $0x8] sm:$0xff] }
  0xec   :  { %v4396_v26 = vpop.f32.mrb[2].mxu0  ;;  %v3557_v34 = vpop.f32.mrb[4].mxu1 }
  0xed   :  { %v4398_v28 = vpop.f32.mrb[3].mxu0  ;;  %v346_v35 = vpop.f32.mrb[5].mxu1 }
  0xee   :  { %v3905_v37 = vpack.c.bf16 %v3557_v34, %v346_v35  ;;  %v4540_v34 = vld [vmem:[%s5236_s4] ss:$0 sm:$0xff]  ;;  %s5239_s4 = sld [smem:[#allocation12_spill]] }
  0xef   :  { %v210_v35 = vadd.f32 %v4540_v34, %v4394_v23 }
  0xf0   :  { %v4400_v31 = vpop.f32.mrb[4].mxu0  ;;  %v3580_v39 = vpop.f32.mrb[6].mxu1 }
  0xf1   :  { %v4402_v33 = vpop.f32.mrb[5].mxu0  ;;  %v532_v40 = vpop.f32.mrb[7].mxu1 }
  0xf2   :  { %v3920_v42 = vpack.c.bf16 %v3580_v39, %v532_v40  ;;  %v4547_v39 = vld [vmem:[%s5237_s3] ss:$0 sm:$0xff]  ;;  %v230_v17 = vadd.f32 %v4540_v34, %v4402_v33  ;;  %v235_v33 = vadd.f32 %v4400_v31, %v4540_v34 }
  0xf4   :  { %v4404_v36 = vpop.f32.mrb[6].mxu0  ;;  %v3583_v45 = vpop.f32.mrb[8].mxu1 }
  0xf5   :  { %v4406_v38 = vpop.f32.mrb[7].mxu0  ;;  %v542_v46 = vpop.f32.mrb[9].mxu1 }
  0xf6   :  { %v3923_v48 = vpack.c.bf16 %v3583_v45, %v542_v46 }
  0xf8   :  { %v3548_v41 = vpop.f32.mrb[8].mxu0  ;;  %v3586_v51 = vpop.f32.mrb[10].mxu1 }
  0xf9   :  { %v316_v43 = vpop.f32.mrb[9].mxu0  ;;  %v552_v52 = vpop.f32.mrb[11].mxu1 }
  0xfa   :  { %v3896_v44 = vpack.c.bf16 %v3548_v41, %v316_v43  ;;  %v3926_v54 = vpack.c.bf16 %v3586_v51, %v552_v52  ;;  %v215_v43 = vadd.f32 %v4392_v22, %v4540_v34 }
  0xfc   :  { %3897 = vmatpush1.bf16.msra.mxu0 %v3896_v44  ;;  %v3564_v47 = vpop.f32.mrb[10].mxu0  ;;  %v3589_v57 = vpop.f32.mrb[12].mxu1 }
  0xfd   :  { %3898 = vmatprep.subr.bf16.mxu0 %v4165_v20  ;;  %v424_v49 = vpop.f32.mrb[11].mxu0  ;;  %v562_v58 = vpop.f32.mrb[13].mxu1 }
  0xfe   :  { %v3908_v50 = vpack.c.bf16 %v3564_v47, %v424_v49  ;;  %v3929_v60 = vpack.c.bf16 %v3589_v57, %v562_v58 }
 0x100   :  { %3900 = vmatpush1.bf16.msra.mxu0 %v3899_v27  ;;  %v3567_v53 = vpop.f32.mrb[12].mxu0  ;;  %v3935_v27 = vpack.c.bf16 %v766_v25, %v765_v24 }
 0x101   :  { %3901 = vmatprep.subr.bf16.mxu0 %v4165_v20  ;;  %v434_v55 = vpop.f32.mrb[13].mxu0 }
 0x102   :  { %v3911_v56 = vpack.c.bf16 %v3567_v53, %v434_v55  ;;  %3936 = vmatprep.subr.bf16.mxu1 %v3935_v27  ;;  %v906_v55 = vld [vmem:[%s5235_s2 + $0x10] sm:$0xff] }
 0x103   :  { %3938 = vmatpush3.bf16.msra.mxu1 %v3935_v27 }
 0x104   :  { %3903 = vmatpush1.bf16.msra.mxu0 %v3902_v32  ;;  %v3570_v59 = vpop.f32.mrb[14].mxu0  ;;  %v3939_v32 = vpack.c.bf16 %v905_v30, %v904_v29 }
 0x105   :  { %3904 = vmatprep.subr.bf16.mxu0 %v4165_v20  ;;  %v444_v61 = vpop.f32.mrb[15].mxu0 }
 0x106   :  { %v3914_v62 = vpack.c.bf16 %v3570_v59, %v444_v61  ;;  %3940 = vmatprep.subr.bf16.mxu1 %v3939_v32 }
 0x108   :  { %3906 = vmatpush1.bf16.msra.mxu0 %v3905_v37  ;;  %v3573_v63 = vpop.f32.mrb[16].mxu0 }
 0x109   :  { %3907 = vmatprep.subr.bf16.mxu0 %v4165_v20  ;;  %v454_v0 = vpop.f32.mrb[17].mxu0 }
 0x10a   :  { %v3917_v1 = vpack.c.bf16 %v3573_v63, %v454_v0 }
 0x10c   :  { %3909 = vmatpush1.bf16.msra.mxu0 %v3908_v50 }
 0x10d   :  { %3910 = vmatprep.subr.bf16.mxu0 %v4165_v20 }
 0x110   :  { %3912 = vmatpush1.bf16.msra.mxu0 %v3911_v56  ;;  %v225_v56 = vadd.f32 %v4396_v26, %v4540_v34  ;;  %v3178_v26 = vld [vmem:[%s5235_s2 + $0x28] sm:$0xff] }
 0x111   :  { %3913 = vmatprep.subr.bf16.mxu0 %v4165_v20 }
 0x114   :  { %3915 = vmatpush1.bf16.msra.mxu0 %v3914_v62 }
 0x115   :  { %3916 = vmatprep.subr.bf16.mxu0 %v4165_v20 }
 0x118   :  { %3918 = vmatpush1.bf16.msra.mxu0 %v3917_v1  ;;  %v3177_v1 = vld [vmem:[%s5235_s2 + $0x20] sm:$0xff] }
 0x119   :  { %3919 = vmatprep.subr.bf16.mxu0 %v4165_v20  ;;  %v3947_v25 = vpack.c.bf16 %v3178_v26, %v3177_v1  ;;  %v3190_v1 = vld [vmem:[%s5235_s2 + $0x48] sm:$0xff] }
 0x11c   :  { %3921 = vmatpush1.bf16.msra.mxu0 %v3920_v42  ;;  %v4552_v42 = vld [vmem:[%s5238_s13] ss:$0 sm:$0xff] }
 0x11d   :  { %3922 = vmatprep.subr.bf16.mxu0 %v4165_v20 }
 0x120   :  { %3924 = vmatpush1.bf16.msra.mxu0 %v3923_v48  ;;  %v220_v48 = vadd.f32 %v4540_v34, %v4398_v28  ;;  %v907_v28 = vld [vmem:[%s5235_s2 + $0x18] sm:$0xff] }
 0x121   :  { %3925 = vmatprep.subr.bf16.mxu0 %v4165_v20 }
 0x124   :  { %3927 = vmatpush1.bf16.msra.mxu0 %v3926_v54 }
 0x125   :  { %3928 = vmatprep.subr.bf16.mxu0 %v4165_v20 }
 0x128   :  { %3930 = vmatpush1.bf16.msra.mxu0 %v3929_v60  ;;  %v3943_v60 = vpack.c.bf16 %v907_v28, %v906_v55 }
 0x129   :  { %3963 = vmatprep.subr.bf16.mxu0 %v4165_v20 }
 0x12b   :  { %661 = vmatmul.mubr.f32.vlgmr.msra.gmra.mrb[18].mxu0 %v4422_v2 }
 0x12c   :  { %3151 = vmatprep.mubr.msk.f32.mxu0 %vm571_vm1, %v4427_v3 }
 0x12f   :  { %666 = vmatmul.mubr.f32.gmra.mrb[20].mxu0 %v4436_v4 }
 0x130   :  { %3152 = vmatprep.mubr.msk.f32.mxu0 %vm571_vm1, %v4441_v5 }
 0x133   :  { %671 = vmatmul.mubr.f32.gmra.mrb[22].mxu0 %v4449_v6 }
 0x134   :  { %3153 = vmatprep.mubr.msk.f32.mxu0 %vm571_vm1, %v4454_v7 }
 0x137   :  { %676 = vmatmul.mubr.f32.gmra.mrb[24].mxu0 %v4462_v8 }
 0x138   :  { %3154 = vmatprep.mubr.msk.f32.mxu0 %vm571_vm1, %v4467_v9 }
 0x13b   :  { %681 = vmatmul.mubr.f32.gmra.mrb[26].mxu0 %v4475_v10 }
 0x13c   :  { %3155 = vmatprep.mubr.msk.f32.mxu0 %vm571_vm1, %v4480_v11 }
 0x13f   :  { %686 = vmatmul.mubr.f32.gmra.mrb[28].mxu0 %v4488_v12 }
 0x140   :  { %3156 = vmatprep.mubr.msk.f32.mxu0 %vm571_vm1, %v4493_v13 }
 0x143   :  { %691 = vmatmul.mubr.f32.gmra.mrb[30].mxu0 %v4501_v14 }
 0x144   :  { %3157 = vmatprep.mubr.msk.f32.mxu0 %vm571_vm1, %v4506_v15 }
 0x147   :  { %696 = vmatmul.mubr.f32.gmra.mrb[32].mxu0 %v4514_v16 }
 0x148   :  { %3201 = vmatprep.mubr.msk.f32.mxu0 %vm571_vm1, %v4388_v21 }
 0x1fe   :  { %v662_v37 = vpop.f32.mrb[18].mxu0 }
 0x1ff   :  { %v701_v40 = vadd.f32 %v662_v37, %v210_v35  ;;  %v664_v41 = vpop.f32.mrb[19].mxu0 }
 0x201   :  { %v716_v44 = vmul.f32 %v4547_v39, %v701_v40 }
 0x202   :  { %v667_v45 = vpop.f32.mrb[20].mxu0 }
 0x203   :  { %v731_v23 = vadd.f32 %v4552_v42, %v716_v44  ;;  %v702_v46 = vadd.f32 %v667_v45, %v215_v43  ;;  %v669_v47 = vpop.f32.mrb[21].mxu0 }
 0x205   :  { %v717_v49 = vmul.f32 %v4547_v39, %v702_v46  ;;  %vm739_vm2 = vcmp.ge.f32.partialorder %v731_v23, 0.0  ;;  %v747_v50 = vmul.f32 0.1, %v731_v23 }
 0x206   :  { %v672_v51 = vpop.f32.mrb[22].mxu0 }
 0x207   :  { %v732_v52 = vadd.f32 %v4552_v42, %v717_v49  ;;  %v703_v53 = vadd.f32 %v672_v51, %v220_v48  ;;  %v674_v22 = vpop.f32.mrb[23].mxu0  ;;  %v4562_v54 = vsel %vm739_vm2, %v731_v23, %v747_v50  ;;  %v240_v23 = vadd.f32 %v4540_v34, %v4406_v38 }
 0x208   :  { %3598 = vmatprep.mubr.msk.f32.mxu1 %vm774_vm3, %v4562_v54 }
 0x209   :  { %vm740_vm4 = vcmp.ge.f32.partialorder %v732_v52, 0.0  ;;  %v748_v57 = vmul.f32 0.1, %v732_v52  ;;  %v718_v58 = vmul.f32 %v4547_v39, %v703_v53 }
 0x20a   :  { %v677_v59 = vpop.f32.mrb[24].mxu0 }
 0x20b   :  { %v733_v61 = vadd.f32 %v4552_v42, %v718_v58  ;;  %v704_v62 = vadd.f32 %v677_v59, %v225_v56  ;;  %v679_v63 = vpop.f32.mrb[25].mxu0  ;;  %v4576_v0 = vsel %vm740_vm4, %v732_v52, %v748_v57  ;;  %v245_v52 = vadd.f32 %v4404_v36, %v4540_v34 }
 0x20c   :  { %3599 = vmatmul.mubr.msk.f32.vlgmr.msra.gmra.mrb[14].mxu1 %vm774_vm3, %v4576_v0  ;;  %v3180_v63 = vld [vmem:[%s5235_s2 + $0x38] sm:$0xff] }
 0x20d   :  { %v719_v18 = vmul.f32 %v4547_v39, %v704_v62  ;;  %vm741_vm5 = vcmp.ge.f32.partialorder %v733_v61, 0.0  ;;  %v749_v19 = vmul.f32 0.1, %v733_v61  ;;  %3942 = vmatpush3.bf16.msra.mxu1 %v3939_v32  ;;  %v3179_v62 = vld [vmem:[%s5235_s2 + $0x30] sm:$0xff] }
 0x20e   :  { %v682_v24 = vpop.f32.mrb[26].mxu0  ;;  %3944 = vmatprep.subr.bf16.mxu1 %v3943_v60 }
 0x20f   :  { %v734_v27 = vadd.f32 %v4552_v42, %v719_v18  ;;  %v705_v29 = vadd.f32 %v682_v24, %v230_v17  ;;  %v684_v30 = vpop.f32.mrb[27].mxu0  ;;  %v4590_v35 = vsel %vm741_vm5, %v733_v61, %v749_v19  ;;  %v3191_v17 = vld [vmem:[%s5235_s2 + $0x50] sm:$0xff]  ;;  %v3192_v18 = vld [vmem:[%s5235_s2 + $0x58] sm:$0xff] }
 0x210   :  { %3601 = vmatprep.mubr.msk.f32.mxu1 %vm774_vm3, %v4590_v35  ;;  %v3959_v19 = vpack.c.bf16 %v3192_v18, %v3191_v17  ;;  %v1400_v17 = vld [vmem:[%s5239_s4] sm:$0xff]  ;;  %v1401_v18 = vld [vmem:[%s5239_s4 + $0x8] sm:$0xff] }
 0x211   :  { %v720_v37 = vmul.f32 %v4547_v39, %v705_v29  ;;  %vm742_vm6 = vcmp.ge.f32.partialorder %v734_v27, 0.0  ;;  %v750_v40 = vmul.f32 0.1, %v734_v27  ;;  %3946 = vmatpush3.bf16.msra.mxu1 %v3943_v60 }
 0x212   :  { %v687_v32 = vpop.f32.mrb[28].mxu0  ;;  %3948 = vmatprep.subr.bf16.mxu1 %v3947_v25 }
 0x213   :  { %v735_v41 = vadd.f32 %v4552_v42, %v720_v37  ;;  %v706_v43 = vadd.f32 %v687_v32, %v235_v33  ;;  %v689_v44 = vpop.f32.mrb[29].mxu0  ;;  %v4598_v45 = vsel %vm742_vm6, %v734_v27, %v750_v40 }
 0x214   :  { %3602 = vmatmul.mubr.msk.f32.gmra.mrb[16].mxu1 %vm774_vm3, %v4598_v45 }
 0x215   :  { %v721_v31 = vmul.f32 %v4547_v39, %v706_v43  ;;  %vm743_vm7 = vcmp.ge.f32.partialorder %v735_v41, 0.0  ;;  %v751_v46 = vmul.f32 0.1, %v735_v41 }
 0x216   :  { %v692_v47 = vpop.f32.mrb[30].mxu0 }
 0x217   :  { %v736_v48 = vadd.f32 %v4552_v42, %v721_v31  ;;  %v707_v49 = vadd.f32 %v692_v47, %v240_v23  ;;  %v694_v50 = vpop.f32.mrb[31].mxu0  ;;  %v759_v51 = vsel %vm743_vm7, %v735_v41, %v751_v46 }
 0x218   :  { %3604 = vmatprep.mubr.msk.f32.mxu1 %vm774_vm3, %v759_v51 }
 0x219   :  { %v722_v53 = vmul.f32 %v4547_v39, %v707_v49  ;;  %vm744_vm8 = vcmp.ge.f32.partialorder %v736_v48, 0.0  ;;  %v752_v22 = vmul.f32 0.1, %v736_v48 }
 0x21a   :  { %v697_v38 = vpop.f32.mrb[32].mxu0 }
 0x21b   :  { %v737_v55 = vadd.f32 %v4552_v42, %v722_v53  ;;  %v708_v28 = vadd.f32 %v697_v38, %v245_v52  ;;  %v699_v56 = vpop.f32.mrb[33].mxu0  ;;  %v760_v57 = vsel %vm744_vm8, %v736_v48, %v752_v22 }
 0x21c   :  { %3605 = vmatmul.mubr.msk.f32.gmra.mrb[18].mxu1 %vm774_vm3, %v760_v57 }
 0x21d   :  { %v723_v58 = vmul.f32 %v4547_v39, %v708_v28  ;;  %vm745_vm9 = vcmp.ge.f32.partialorder %v737_v55, 0.0  ;;  %v753_v59 = vmul.f32 0.1, %v737_v55  ;;  %v3951_v39 = vpack.c.bf16 %v3180_v63, %v3179_v62 }
 0x21f   :  { %v738_v60 = vadd.f32 %v4552_v42, %v723_v58  ;;  %v761_v61 = vsel %vm745_vm9, %v737_v55, %v753_v59  ;;  %v3189_v42 = vld [vmem:[%s5235_s2 + $0x40] sm:$0xff] }
 0x220   :  { %3607 = vmatprep.mubr.msk.f32.mxu1 %vm774_vm3, %v761_v61  ;;  %v3955_v26 = vpack.c.bf16 %v3190_v1, %v3189_v42 }
 0x221   :  { %vm746_vm10 = vcmp.ge.f32.partialorder %v738_v60, 0.0  ;;  %v754_v36 = vmul.f32 0.1, %v738_v60 }
 0x223   :  { %v762_v34 = vsel %vm746_vm10, %v738_v60, %v754_v36 }
 0x224   :  { %3608 = vmatmul.mubr.msk.f32.gmra.mrb[20].mxu1 %vm774_vm3, %v762_v34 }
 0x225   :  { %3618 = vmatprep.mubr.msk.f32.mxu1 %vm774_vm3, %v4562_v54 }
 0x228   :  { %3619 = vmatmul.mubr.msk.f32.vlgmr.msra.gmra.mrb[22].mxu1 %vm774_vm3, %v4576_v0 }
 0x229   :  { %3621 = vmatprep.mubr.msk.f32.mxu1 %vm774_vm3, %v4590_v35  ;;  %3950 = vmatpush3.bf16.msra.mxu1 %v3947_v25 }
 0x22a   :  { %3952 = vmatprep.subr.bf16.mxu1 %v3951_v39 }
 0x22c   :  { %3622 = vmatmul.mubr.msk.f32.gmra.mrb[24].mxu1 %vm774_vm3, %v4598_v45 }
 0x22d   :  { %3624 = vmatprep.mubr.msk.f32.mxu1 %vm774_vm3, %v759_v51  ;;  %3954 = vmatpush3.bf16.msra.mxu1 %v3951_v39 }
 0x22e   :  { %3956 = vmatprep.subr.bf16.mxu1 %v3955_v26 }
 0x230   :  { %3625 = vmatmul.mubr.msk.f32.gmra.mrb[26].mxu1 %vm774_vm3, %v760_v57 }
 0x231   :  { %3627 = vmatprep.mubr.msk.f32.mxu1 %vm774_vm3, %v761_v61 }
 0x234   :  { %3628 = vmatmul.mubr.msk.f32.gmra.mrb[28].mxu1 %vm774_vm3, %v762_v34 }
 0x235   :  { %3638 = vmatprep.mubr.msk.f32.mxu1 %vm774_vm3, %v4562_v54 }
 0x238   :  { %3639 = vmatmul.mubr.msk.f32.vlgmr.msra.gmra.mrb[30].mxu1 %vm774_vm3, %v4576_v0 }
 0x239   :  { %3641 = vmatprep.mubr.msk.f32.mxu1 %vm774_vm3, %v4590_v35  ;;  %3958 = vmatpush3.bf16.msra.mxu1 %v3955_v26 }
 0x23a   :  { %3960 = vmatprep.subr.bf16.mxu1 %v3959_v19 }
 0x23c   :  { %3642 = vmatmul.mubr.msk.f32.gmra.mrb[32].mxu1 %vm774_vm3, %v4598_v45 }
 0x23d   :  { %3644 = vmatprep.mubr.msk.f32.mxu1 %vm774_vm3, %v759_v51  ;;  %3962 = vmatpush3.bf16.msra.mxu1 %v3959_v19  ;;  %v3999_v19 = vpack.c.bf16 %v1401_v18, %v1400_v17 }
 0x23f   :  { %4000 = vmatprep.subr.bf16.mxu1 %v3999_v19 }
 0x240   :  { %3645 = vmatmul.mubr.msk.f32.gmra.mrb[34].mxu1 %vm774_vm3, %v760_v57 }
 0x241   :  { %3647 = vmatprep.mubr.msk.f32.mxu1 %vm774_vm3, %v761_v61 }
 0x244   :  { %3648 = vmatmul.mubr.msk.f32.gmra.mrb[36].mxu1 %vm774_vm3, %v762_v34 }
 0x245   :  { %3658 = vmatprep.mubr.msk.f32.mxu1 %vm774_vm3, %v4562_v54 }
 0x248   :  { %3659 = vmatmul.mubr.msk.f32.vlgmr.msra.gmra.mrb[38].mxu1 %vm774_vm3, %v4576_v0 }
 0x249   :  { %3661 = vmatprep.mubr.msk.f32.mxu1 %vm774_vm3, %v4590_v35  ;;  %4002 = vmatpush3.bf16.msra.mxu1 %v3999_v19 }
 0x24c   :  { %3662 = vmatmul.mubr.msk.f32.gmra.mrb[40].mxu1 %vm774_vm3, %v4598_v45 }
 0x24d   :  { %3664 = vmatprep.mubr.msk.f32.mxu1 %vm774_vm3, %v759_v51 }
 0x250   :  { %3665 = vmatmul.mubr.msk.f32.gmra.mrb[42].mxu1 %vm774_vm3, %v760_v57 }
 0x251   :  { %3667 = vmatprep.mubr.msk.f32.mxu1 %vm774_vm3, %v761_v61 }
 0x254   :  { %3668 = vmatmul.mubr.msk.f32.gmra.mrb[44].mxu1 %vm774_vm3, %v762_v34 }
 0x2df   :  { %v4670_v24 = vpop.f32.mrb[14].mxu1 }
 0x2e0   :  { %v4672_v54 = vpop.f32.mrb[15].mxu1 }
 0x2e7   :  { %v4674_v25 = vpop.f32.mrb[16].mxu1 }
 0x2e8   :  { %v4676_v0 = vpop.f32.mrb[17].mxu1 }
 0x2ef   :  { %v4678_v27 = vpop.f32.mrb[18].mxu1 }
 0x2f0   :  { %v4680_v29 = vpop.f32.mrb[19].mxu1 }
 0x2f7   :  { %v4682_v30 = vpop.f32.mrb[20].mxu1 }
 0x2f8   :  { %v4684_v35 = vpop.f32.mrb[21].mxu1 }
 0x2fb   :  { %v3620_v33 = vpop.f32.mrb[22].mxu1 }
 0x2fc   :  { %v974_v37 = vpop.f32.mrb[23].mxu1 }
 0x2fd   :  { %v3964_v40 = vpack.c.bf16 %v3620_v33, %v974_v37  ;;  %v3240_v33 = vld [vmem:[%s5240_s5 + $0x40] sm:$0xff]  ;;  %v3241_v37 = vld [vmem:[%s5240_s5 + $0x48] sm:$0xff] }
 0x2ff   :  { %v3623_v32 = vpop.f32.mrb[24].mxu1  ;;  %3965 = vmatpush1.bf16.msra.mxu0 %v3964_v40  ;;  %v4023_v40 = vpack.c.bf16 %v3241_v37, %v3240_v33 }
 0x300   :  { %v984_v41 = vpop.f32.mrb[25].mxu1  ;;  %3966 = vmatprep.subr.bf16.mxu0 %v4165_v20 }
 0x301   :  { %v3967_v43 = vpack.c.bf16 %v3623_v32, %v984_v41  ;;  %v1402_v32 = vld [vmem:[%s5239_s4 + $0x10] sm:$0xff]  ;;  %v1403_v41 = vld [vmem:[%s5239_s4 + $0x18] sm:$0xff] }
 0x303   :  { %v3626_v44 = vpop.f32.mrb[26].mxu1  ;;  %3968 = vmatpush1.bf16.msra.mxu0 %v3967_v43  ;;  %v3242_v43 = vld [vmem:[%s5240_s5 + $0x50] sm:$0xff] }
 0x304   :  { %v994_v45 = vpop.f32.mrb[27].mxu1  ;;  %3969 = vmatprep.subr.bf16.mxu0 %v4165_v20 }
 0x305   :  { %v3970_v23 = vpack.c.bf16 %v3626_v44, %v994_v45  ;;  %v4003_v44 = vpack.c.bf16 %v1403_v41, %v1402_v32  ;;  %v3243_v45 = vld [vmem:[%s5240_s5 + $0x58] sm:$0xff] }
 0x307   :  { %v3629_v31 = vpop.f32.mrb[28].mxu1  ;;  %3971 = vmatpush1.bf16.msra.mxu0 %v3970_v23  ;;  %v4027_v23 = vpack.c.bf16 %v3243_v45, %v3242_v43  ;;  %4004 = vmatprep.subr.bf16.mxu1 %v4003_v44 }
 0x308   :  { %v1004_v46 = vpop.f32.mrb[29].mxu1  ;;  %3972 = vmatprep.subr.bf16.mxu0 %v4165_v20  ;;  %4006 = vmatpush3.bf16.msra.mxu1 %v4003_v44 }
 0x309   :  { %v3973_v47 = vpack.c.bf16 %v3629_v31, %v1004_v46  ;;  %v1540_v31 = vld [vmem:[%s5240_s5] sm:$0xff]  ;;  %v1541_v46 = vld [vmem:[%s5240_s5 + $0x8] sm:$0xff] }
 0x30b   :  { %v3640_v48 = vpop.f32.mrb[30].mxu1  ;;  %3974 = vmatpush1.bf16.msra.mxu0 %v3973_v47  ;;  %v4007_v47 = vpack.c.bf16 %v1541_v46, %v1540_v31 }
 0x30c   :  { %v1084_v49 = vpop.f32.mrb[31].mxu1  ;;  %3975 = vmatprep.subr.bf16.mxu0 %v4165_v20 }
 0x30d   :  { %v3976_v50 = vpack.c.bf16 %v3640_v48, %v1084_v49  ;;  %4008 = vmatprep.subr.bf16.mxu1 %v4007_v47  ;;  %v4752_v48 = vld [vmem:[%s5195_s9] ss:$0 sm:$0xff] }
 0x30e   :  { %v866_v49 = vadd.f32 %v4752_v48, %v4672_v54  ;;  %v886_v32 = vadd.f32 %v4752_v48, %v4680_v29  ;;  %v891_v29 = vadd.f32 %v4678_v27, %v4752_v48 }
 0x30f   :  { %v3643_v51 = vpop.f32.mrb[32].mxu1  ;;  %3977 = vmatpush1.bf16.msra.mxu0 %v3976_v50 }
 0x310   :  { %v1094_v52 = vpop.f32.mrb[33].mxu1  ;;  %3978 = vmatprep.subr.bf16.mxu0 %v4165_v20 }
 0x311   :  { %v3979_v53 = vpack.c.bf16 %v3643_v51, %v1094_v52  ;;  %v4759_v51 = vld [vmem:[%s5196_s10] ss:$0 sm:$0xff] }
 0x313   :  { %v3646_v22 = vpop.f32.mrb[34].mxu1  ;;  %3980 = vmatpush1.bf16.msra.mxu0 %v3979_v53 }
 0x314   :  { %v1104_v38 = vpop.f32.mrb[35].mxu1  ;;  %3981 = vmatprep.subr.bf16.mxu0 %v4165_v20 }
 0x315   :  { %v3982_v55 = vpack.c.bf16 %v3646_v22, %v1104_v38  ;;  %v4764_v22 = vld [vmem:[%s5197_s11] ss:$0 sm:$0xff]  ;;  %v871_v38 = vadd.f32 %v4670_v24, %v4752_v48 }
 0x317   :  { %v3649_v28 = vpop.f32.mrb[36].mxu1  ;;  %3983 = vmatpush1.bf16.msra.mxu0 %v3982_v55 }
 0x318   :  { %v1114_v56 = vpop.f32.mrb[37].mxu1  ;;  %3984 = vmatprep.subr.bf16.mxu0 %v4165_v20 }
 0x319   :  { %v3985_v57 = vpack.c.bf16 %v3649_v28, %v1114_v56 }
 0x31b   :  { %v3660_v58 = vpop.f32.mrb[38].mxu1  ;;  %3986 = vmatpush1.bf16.msra.mxu0 %v3985_v57 }
 0x31c   :  { %v1194_v59 = vpop.f32.mrb[39].mxu1  ;;  %3987 = vmatprep.subr.bf16.mxu0 %v4165_v20 }
 0x31d   :  { %v3988_v60 = vpack.c.bf16 %v3660_v58, %v1194_v59  ;;  %v876_v58 = vadd.f32 %v4752_v48, %v4676_v0  ;;  %v881_v0 = vadd.f32 %v4674_v25, %v4752_v48  ;;  %v3229_v25 = vld [vmem:[%s5240_s5 + $0x28] sm:$0xff] }
 0x31f   :  { %v3663_v61 = vpop.f32.mrb[40].mxu1  ;;  %3989 = vmatpush1.bf16.msra.mxu0 %v3988_v60 }
 0x320   :  { %v1204_v36 = vpop.f32.mrb[41].mxu1  ;;  %3990 = vmatprep.subr.bf16.mxu0 %v4165_v20 }
 0x321   :  { %v3991_v34 = vpack.c.bf16 %v3663_v61, %v1204_v36 }
 0x323   :  { %v3666_v62 = vpop.f32.mrb[42].mxu1  ;;  %3992 = vmatpush1.bf16.msra.mxu0 %v3991_v34 }
 0x324   :  { %v1214_v63 = vpop.f32.mrb[43].mxu1  ;;  %3993 = vmatprep.subr.bf16.mxu0 %v4165_v20 }
 0x325   :  { %v3994_v39 = vpack.c.bf16 %v3666_v62, %v1214_v63  ;;  %v1542_v63 = vld [vmem:[%s5240_s5 + $0x10] sm:$0xff] }
 0x327   :  { %v3669_v42 = vpop.f32.mrb[44].mxu1  ;;  %3995 = vmatpush1.bf16.msra.mxu0 %v3994_v39  ;;  %v1543_v39 = vld [vmem:[%s5240_s5 + $0x18] sm:$0xff] }
 0x328   :  { %v1224_v1 = vpop.f32.mrb[45].mxu1  ;;  %3996 = vmatprep.subr.bf16.mxu0 %v4165_v20  ;;  %v4011_v17 = vpack.c.bf16 %v1543_v39, %v1542_v63 }
 0x329   :  { %v3997_v26 = vpack.c.bf16 %v3669_v42, %v1224_v1 }
 0x32b   :  { %3998 = vmatpush1.bf16.msra.mxu0 %v3997_v26 }
 0x32c   :  { %4024 = vmatprep.subr.bf16.mxu0 %v4023_v40 }
 0x32e   :  { %1298 = vmatmul.mubr.f32.vlgmr.msra.gmra.mrb[34].mxu0 %v4422_v2 }
 0x32f   :  { %3202 = vmatprep.mubr.msk.f32.mxu0 %vm571_vm1, %v4427_v3  ;;  %4026 = vmatpush3.bf16.msra.mxu0 %v4023_v40  ;;  %v3228_v40 = vld [vmem:[%s5240_s5 + $0x20] sm:$0xff] }
 0x330   :  { %4028 = vmatprep.subr.bf16.mxu0 %v4027_v23  ;;  %v4015_v45 = vpack.c.bf16 %v3229_v25, %v3228_v40 }
 0x332   :  { %1303 = vmatmul.mubr.f32.gmra.mrb[36].mxu0 %v4436_v4 }
 0x333   :  { %3203 = vmatprep.mubr.msk.f32.mxu0 %vm571_vm1, %v4441_v5  ;;  %4030 = vmatpush3.bf16.msra.mxu0 %v4027_v23 }
 0x336   :  { %1308 = vmatmul.mubr.f32.gmra.mrb[38].mxu0 %v4449_v6 }
 0x337   :  { %3204 = vmatprep.mubr.msk.f32.mxu0 %vm571_vm1, %v4454_v7 }
 0x33a   :  { %1313 = vmatmul.mubr.f32.gmra.mrb[40].mxu0 %v4462_v8 }
 0x33b   :  { %3205 = vmatprep.mubr.msk.f32.mxu0 %vm571_vm1, %v4467_v9 }
 0x33e   :  { %1318 = vmatmul.mubr.f32.gmra.mrb[42].mxu0 %v4475_v10 }
 0x33f   :  { %3206 = vmatprep.mubr.msk.f32.mxu0 %vm571_vm1, %v4480_v11 }
 0x342   :  { %1323 = vmatmul.mubr.f32.gmra.mrb[44].mxu0 %v4488_v12 }
 0x343   :  { %3207 = vmatprep.mubr.msk.f32.mxu0 %vm571_vm1, %v4493_v13 }
 0x346   :  { %1328 = vmatmul.mubr.f32.gmra.mrb[46].mxu0 %v4501_v14 }
 0x347   :  { %3208 = vmatprep.mubr.msk.f32.mxu0 %vm571_vm1, %v4506_v15 }
 0x34a   :  { %1333 = vmatmul.mubr.f32.gmra.mrb[48].mxu0 %v4514_v16 }
 0x401   :  { %v1299_v50 = vpop.f32.mrb[34].mxu0 }
 0x402   :  { %v1338_v52 = vadd.f32 %v1299_v50, %v866_v49  ;;  %v1301_v53 = vpop.f32.mrb[35].mxu0 }
 0x404   :  { %v1353_v55 = vmul.f32 %v4759_v51, %v1338_v52 }
 0x405   :  { %v1304_v28 = vpop.f32.mrb[36].mxu0 }
 0x406   :  { %v1368_v54 = vadd.f32 %v4764_v22, %v1353_v55  ;;  %v1339_v56 = vadd.f32 %v1304_v28, %v871_v38  ;;  %v1306_v57 = vpop.f32.mrb[37].mxu0 }
 0x408   :  { %v1354_v59 = vmul.f32 %v4759_v51, %v1339_v56  ;;  %vm1376_vm11 = vcmp.ge.f32.partialorder %v1368_v54, 0.0  ;;  %v1384_v60 = vmul.f32 0.1, %v1368_v54 }
 0x409   :  { %v1309_v61 = vpop.f32.mrb[38].mxu0 }
 0x40a   :  { %v1369_v36 = vadd.f32 %v4764_v22, %v1354_v59  ;;  %v1340_v34 = vadd.f32 %v1309_v61, %v876_v58  ;;  %v1311_v62 = vpop.f32.mrb[39].mxu0  ;;  %v4774_v24 = vsel %vm1376_vm11, %v1368_v54, %v1384_v60  ;;  %v896_v54 = vadd.f32 %v4752_v48, %v4684_v35 }
 0x40b   :  { %3678 = vmatprep.mubr.msk.f32.mxu1 %vm774_vm3, %v4774_v24  ;;  %3738 = vmatprep.mubr.msk.f32.mxu0 %vm774_vm3, %v4774_v24 }
 0x40c   :  { %vm1377_vm12 = vcmp.ge.f32.partialorder %v1369_v36, 0.0  ;;  %v1385_v42 = vmul.f32 0.1, %v1369_v36  ;;  %v1355_v1 = vmul.f32 %v4759_v51, %v1340_v34 }
 0x40d   :  { %v1314_v26 = vpop.f32.mrb[40].mxu0 }
 0x40e   :  { %v1370_v18 = vadd.f32 %v4764_v22, %v1355_v1  ;;  %v1341_v19 = vadd.f32 %v1314_v26, %v881_v0  ;;  %v1316_v33 = vpop.f32.mrb[41].mxu0  ;;  %v4790_v37 = vsel %vm1377_vm12, %v1369_v36, %v1385_v42  ;;  %v901_v36 = vadd.f32 %v4682_v30, %v4752_v48 }
 0x40f   :  { %3679 = vmatmul.mubr.msk.f32.vlgmr.msra.gmra.mrb[46].mxu1 %vm774_vm3, %v4790_v37  ;;  %3739 = vmatmul.mubr.msk.f32.vlgmr.msra.gmra.mrb[50].mxu0 %vm774_vm3, %v4790_v37  ;;  %v1983_v33 = vld [vmem:[%s5198_s15 + $0x8] sm:$0xff] }
 0x410   :  { %v1356_v41 = vmul.f32 %v4759_v51, %v1341_v19  ;;  %vm1378_vm13 = vcmp.ge.f32.partialorder %v1370_v18, 0.0  ;;  %v1386_v43 = vmul.f32 0.1, %v1370_v18  ;;  %4010 = vmatpush3.bf16.msra.mxu1 %v4007_v47  ;;  %v3230_v19 = vld [vmem:[%s5240_s5 + $0x30] sm:$0xff] }
 0x411   :  { %v1319_v44 = vpop.f32.mrb[42].mxu0  ;;  %4012 = vmatprep.subr.bf16.mxu1 %v4011_v17 }
 0x412   :  { %v1371_v23 = vadd.f32 %v4764_v22, %v1356_v41  ;;  %v1342_v31 = vadd.f32 %v1319_v44, %v886_v32  ;;  %v1321_v46 = vpop.f32.mrb[43].mxu0  ;;  %v4806_v49 = vsel %vm1378_vm13, %v1370_v18, %v1386_v43 }
 0x413   :  { %3681 = vmatprep.mubr.msk.f32.mxu1 %vm774_vm3, %v4806_v49  ;;  %3741 = vmatprep.mubr.msk.f32.mxu0 %vm774_vm3, %v4806_v49 }
 0x414   :  { %v1357_v47 = vmul.f32 %v4759_v51, %v1342_v31  ;;  %vm1379_vm14 = vcmp.ge.f32.partialorder %v1371_v23, 0.0  ;;  %v1387_v50 = vmul.f32 0.1, %v1371_v23  ;;  %4014 = vmatpush3.bf16.msra.mxu1 %v4011_v17 }
 0x415   :  { %v1324_v52 = vpop.f32.mrb[44].mxu0  ;;  %4016 = vmatprep.subr.bf16.mxu1 %v4015_v45 }
 0x416   :  { %v1372_v53 = vadd.f32 %v4764_v22, %v1357_v47  ;;  %v1343_v38 = vadd.f32 %v1324_v52, %v891_v29  ;;  %v1326_v55 = vpop.f32.mrb[45].mxu0  ;;  %v1395_v28 = vsel %vm1379_vm14, %v1371_v23, %v1387_v50  ;;  %vm2284_vm14 = vcmask 7168  }
 0x417   :  { %3682 = vmatmul.mubr.msk.f32.gmra.mrb[48].mxu1 %vm774_vm3, %v1395_v28  ;;  %3742 = vmatmul.mubr.msk.f32.gmra.mrb[52].mxu0 %vm774_vm3, %v1395_v28 }
 0x418   :  { %v1358_v27 = vmul.f32 %v4759_v51, %v1343_v38  ;;  %vm1380_vm15 = vcmp.ge.f32.partialorder %v1372_v53, 0.0  ;;  %v1388_v56 = vmul.f32 0.1, %v1372_v53 }
 0x419   :  { %v1329_v57 = vpop.f32.mrb[46].mxu0 }
 0x41a   :  { %v1373_v58 = vadd.f32 %v4764_v22, %v1358_v27  ;;  %v1344_v59 = vadd.f32 %v1329_v57, %v896_v54  ;;  %v1331_v60 = vpop.f32.mrb[47].mxu0  ;;  %v1396_v61 = vsel %vm1380_vm15, %v1372_v53, %v1388_v56  ;;  %vm4167_vm15 = vmmov 0  }
 0x41b   :  { %3684 = vmatprep.mubr.msk.f32.mxu1 %vm774_vm3, %v1396_v61  ;;  %3744 = vmatprep.mubr.msk.f32.mxu0 %vm774_vm3, %v1396_v61 }
 0x41c   :  { %v1359_v34 = vmul.f32 %v4759_v51, %v1344_v59  ;;  %vm1381_vm2 = vcmp.ge.f32.partialorder %v1373_v58, 0.0  ;;  %v1389_v35 = vmul.f32 0.1, %v1373_v58 }
 0x41d   :  { %v1334_v62 = vpop.f32.mrb[48].mxu0 }
 0x41e   :  { %v1374_v63 = vadd.f32 %v4764_v22, %v1359_v34  ;;  %v1345_v39 = vadd.f32 %v1334_v62, %v901_v36  ;;  %v1336_v0 = vpop.f32.mrb[49].mxu0  ;;  %v1397_v42 = vsel %vm1381_vm2, %v1373_v58, %v1389_v35  ;;  %vm2490_vm2 = vcmask 15360  }
 0x41f   :  { %3685 = vmatmul.mubr.msk.f32.gmra.mrb[50].mxu1 %vm774_vm3, %v1397_v42  ;;  %3745 = vmatmul.mubr.msk.f32.gmra.mrb[54].mxu0 %vm774_vm3, %v1397_v42 }
 0x420   :  { %v1360_v1 = vmul.f32 %v4759_v51, %v1345_v39  ;;  %vm1382_vm4 = vcmp.ge.f32.partialorder %v1374_v63, 0.0  ;;  %v1390_v26 = vmul.f32 0.1, %v1374_v63  ;;  %v3231_v51 = vld [vmem:[%s5240_s5 + $0x38] sm:$0xff] }
 0x422   :  { %v1375_v30 = vadd.f32 %v4764_v22, %v1360_v1  ;;  %v1398_v48 = vsel %vm1382_vm4, %v1374_v63, %v1390_v26  ;;  %v4019_v22 = vpack.c.bf16 %v3231_v51, %v3230_v19 }
 0x423   :  { %3687 = vmatprep.mubr.msk.f32.mxu1 %vm774_vm3, %v1398_v48  ;;  %3747 = vmatprep.mubr.msk.f32.mxu0 %vm774_vm3, %v1398_v48 }
 0x424   :  { %vm1383_vm5 = vcmp.ge.f32.partialorder %v1375_v30, 0.0  ;;  %v1391_v17 = vmul.f32 0.1, %v1375_v30 }
 0x426   :  { %v1399_v18 = vsel %vm1383_vm5, %v1375_v30, %v1391_v17 }
 0x427   :  { %3688 = vmatmul.mubr.msk.f32.gmra.mrb[52].mxu1 %vm774_vm3, %v1399_v18  ;;  %3748 = vmatmul.mubr.msk.f32.gmra.mrb[56].mxu0 %vm774_vm3, %v1399_v18 }
 0x428   :  { %3698 = vmatprep.mubr.msk.f32.mxu1 %vm774_vm3, %v4774_v24 }
 0x42b   :  { %3699 = vmatmul.mubr.msk.f32.vlgmr.msra.gmra.mrb[54].mxu1 %vm774_vm3, %v4790_v37 }
 0x42c   :  { %3701 = vmatprep.mubr.msk.f32.mxu1 %vm774_vm3, %v4806_v49  ;;  %4018 = vmatpush3.bf16.msra.mxu1 %v4015_v45 }
 0x42d   :  { %4020 = vmatprep.subr.bf16.mxu1 %v4019_v22 }
 0x42f   :  { %3702 = vmatmul.mubr.msk.f32.gmra.mrb[56].mxu1 %vm774_vm3, %v1395_v28 }
 0x430   :  { %3704 = vmatprep.mubr.msk.f32.mxu1 %vm774_vm3, %v1396_v61  ;;  %4022 = vmatpush3.bf16.msra.mxu1 %v4019_v22 }
 0x431   :  { %4031 = vmatprep.subr.bf16.mxu1 %v4165_v20 }
 0x433   :  { %3705 = vmatmul.mubr.msk.f32.gmra.mrb[58].mxu1 %vm774_vm3, %v1397_v42 }
 0x434   :  { %3707 = vmatprep.mubr.msk.f32.mxu1 %vm774_vm3, %v1398_v48 }
 0x437   :  { %3708 = vmatmul.mubr.msk.f32.gmra.mrb[60].mxu1 %vm774_vm3, %v1399_v18 }
 0x438   :  { %3718 = vmatprep.mubr.msk.f32.mxu1 %vm774_vm3, %v4774_v24  ;;  %v1982_v24 = vld [vmem:[%s5198_s15] sm:$0xff] }
 0x43b   :  { %3719 = vmatmul.mubr.msk.f32.vlgmr.msra.gmra.mrb[62].mxu1 %vm774_vm3, %v4790_v37  ;;  %v4067_v37 = vpack.c.bf16 %v1983_v33, %v1982_v24 }
 0x43c   :  { %3721 = vmatprep.mubr.msk.f32.mxu1 %vm774_vm3, %v4806_v49 }
 0x43d   :  { %4068 = vmatprep.subr.bf16.mxu0 %v4067_v37 }
 0x43e   :  { %4070 = vmatpush3.bf16.msra.mxu0 %v4067_v37 }
 0x43f   :  { %3722 = vmatmul.mubr.msk.f32.gmra.mrb[64].mxu1 %vm774_vm3, %v1395_v28 }
 0x440   :  { %3724 = vmatprep.mubr.msk.f32.mxu1 %vm774_vm3, %v1396_v61 }
 0x443   :  { %3725 = vmatmul.mubr.msk.f32.gmra.mrb[66].mxu1 %vm774_vm3, %v1397_v42 }
 0x444   :  { %3727 = vmatprep.mubr.msk.f32.mxu1 %vm774_vm3, %v1398_v48 }
 0x447   :  { %3728 = vmatmul.mubr.msk.f32.gmra.mrb[68].mxu1 %vm774_vm3, %v1399_v18 }
 0x448   :  { %3252 = vmatprep.mubr.msk.f32.mxu1 %vm571_vm1, %v4388_v21 }
 0x4e2   :  { %v4873_v40 = vpop.f32.mrb[46].mxu1  ;;  %v3740_v25 = vpop.f32.mrb[50].mxu0 }
 0x4e3   :  { %v4875_v32 = vpop.f32.mrb[47].mxu1  ;;  %v1830_v41 = vpop.f32.mrb[51].mxu0 }
 0x4e4   :  { %v4056_v43 = vpack.c.bf16 %v3740_v25, %v1830_v41 }
 0x4ea   :  { %v4877_v44 = vpop.f32.mrb[48].mxu1  ;;  %v3743_v21 = vpop.f32.mrb[52].mxu0 }
 0x4eb   :  { %v4879_v45 = vpop.f32.mrb[49].mxu1  ;;  %v1840_v23 = vpop.f32.mrb[53].mxu0 }
 0x4ec   :  { %v4059_v31 = vpack.c.bf16 %v3743_v21, %v1840_v23 }
 0x4f2   :  { %v4881_v46 = vpop.f32.mrb[50].mxu1  ;;  %v3746_v49 = vpop.f32.mrb[54].mxu0 }
 0x4f3   :  { %v4883_v29 = vpop.f32.mrb[51].mxu1  ;;  %v1850_v47 = vpop.f32.mrb[55].mxu0 }
 0x4f4   :  { %v4062_v50 = vpack.c.bf16 %v3746_v49, %v1850_v47 }
 0x4fa   :  { %v4885_v52 = vpop.f32.mrb[52].mxu1  ;;  %v3749_v53 = vpop.f32.mrb[56].mxu0 }
 0x4fb   :  { %v4887_v38 = vpop.f32.mrb[53].mxu1  ;;  %v1860_v55 = vpop.f32.mrb[57].mxu0 }
 0x4fc   :  { %v4065_v28 = vpack.c.bf16 %v3749_v53, %v1860_v55 }
 0x4fe   :  { %v3700_v54 = vpop.f32.mrb[54].mxu1 }
 0x4ff   :  { %v1610_v27 = vpop.f32.mrb[55].mxu1 }
 0x500   :  { %v4032_v56 = vpack.c.bf16 %v3700_v54, %v1610_v27  ;;  %v3260_v27 = vld [vmem:[%s5202_s16] ss:$0 sm:$0xff] }
 0x502   :  { %v3703_v57 = vpop.f32.mrb[56].mxu1  ;;  %4033 = vmatpush1.bf16.msra.mxu1 %v4032_v56 }
 0x503   :  { %v1620_v58 = vpop.f32.mrb[57].mxu1  ;;  %4034 = vmatprep.subr.bf16.mxu1 %v4165_v20 }
 0x504   :  { %v4035_v59 = vpack.c.bf16 %v3703_v57, %v1620_v58 }
 0x506   :  { %v3706_v60 = vpop.f32.mrb[58].mxu1  ;;  %4036 = vmatpush1.bf16.msra.mxu1 %v4035_v59 }
 0x507   :  { %v1630_v61 = vpop.f32.mrb[59].mxu1  ;;  %4037 = vmatprep.subr.bf16.mxu1 %v4165_v20 }
 0x508   :  { %v4038_v36 = vpack.c.bf16 %v3706_v60, %v1630_v61 }
 0x50a   :  { %v3709_v34 = vpop.f32.mrb[60].mxu1  ;;  %4039 = vmatpush1.bf16.msra.mxu1 %v4038_v36 }
 0x50b   :  { %v1640_v35 = vpop.f32.mrb[61].mxu1  ;;  %4040 = vmatprep.subr.bf16.mxu1 %v4165_v20 }
 0x50c   :  { %v4041_v62 = vpack.c.bf16 %v3709_v34, %v1640_v35 }
 0x50e   :  { %v3720_v63 = vpop.f32.mrb[62].mxu1  ;;  %4042 = vmatpush1.bf16.msra.mxu1 %v4041_v62 }
 0x50f   :  { %v1720_v39 = vpop.f32.mrb[63].mxu1  ;;  %4043 = vmatprep.subr.bf16.mxu1 %v4165_v20 }
 0x510   :  { %v4044_v0 = vpack.c.bf16 %v3720_v63, %v1720_v39 }
 0x512   :  { %v3723_v42 = vpop.f32.mrb[64].mxu1  ;;  %4045 = vmatpush1.bf16.msra.mxu1 %v4044_v0 }
 0x513   :  { %v1730_v1 = vpop.f32.mrb[65].mxu1  ;;  %4046 = vmatprep.subr.bf16.mxu1 %v4165_v20 }
 0x514   :  { %v4047_v26 = vpack.c.bf16 %v3723_v42, %v1730_v1 }
 0x516   :  { %v3726_v30 = vpop.f32.mrb[66].mxu1  ;;  %4048 = vmatpush1.bf16.msra.mxu1 %v4047_v26 }
 0x517   :  { %v1740_v48 = vpop.f32.mrb[67].mxu1  ;;  %4049 = vmatprep.subr.bf16.mxu1 %v4165_v20 }
 0x518   :  { %v4050_v17 = vpack.c.bf16 %v3726_v30, %v1740_v48 }
 0x51a   :  { %v3729_v18 = vpop.f32.mrb[68].mxu1  ;;  %4051 = vmatpush1.bf16.msra.mxu1 %v4050_v17 }
 0x51b   :  { %v1750_v19 = vpop.f32.mrb[69].mxu1  ;;  %4052 = vmatprep.subr.bf16.mxu1 %v4165_v20 }
 0x51c   :  { %v4053_v51 = vpack.c.bf16 %v3729_v18, %v1750_v19 }
 0x51e   :  { %4054 = vmatpush1.bf16.msra.mxu1 %v4053_v51 }
 0x51f   :  { %4055 = vmatprep.subr.bf16.mxu1 %v4165_v20 }
 0x522   :  { %4057 = vmatpush1.bf16.msra.mxu1 %v4056_v43 }
 0x523   :  { %4058 = vmatprep.subr.bf16.mxu1 %v4165_v20 }
 0x526   :  { %4060 = vmatpush1.bf16.msra.mxu1 %v4059_v31 }
 0x527   :  { %4061 = vmatprep.subr.bf16.mxu1 %v4165_v20 }
 0x52a   :  { %4063 = vmatpush1.bf16.msra.mxu1 %v4062_v50 }
 0x52b   :  { %4064 = vmatprep.subr.bf16.mxu1 %v4165_v20 }
 0x52e   :  { %4066 = vmatpush1.bf16.msra.mxu1 %v4065_v28  ;;  %v2147_v28 = vld [vmem:[%s5200_s17 + $0x8] sm:$0xff] }
 0x531   :  { %1934 = vmatmul.mubr.f32.vlgmr.msra.gmra.mrb[70].mxu1 %v4422_v2  ;;  %v1984_v2 = vld [vmem:[%s5198_s15 + $0x10] sm:$0xff] }
 0x532   :  { %3253 = vmatprep.mubr.msk.f32.mxu1 %vm571_vm1, %v4427_v3  ;;  %v1985_v3 = vld [vmem:[%s5198_s15 + $0x18] sm:$0xff] }
 0x535   :  { %1939 = vmatmul.mubr.f32.gmra.mrb[72].mxu1 %v4436_v4  ;;  %v4071_v4 = vpack.c.bf16 %v1985_v3, %v1984_v2 }
 0x536   :  { %3254 = vmatprep.mubr.msk.f32.mxu1 %vm571_vm1, %v4441_v5  ;;  %v3211_v5 = vld [vmem:[%s5199_s14] ss:$0 sm:$0xff] }
 0x537   :  { %4072 = vmatprep.subr.bf16.mxu0 %v4071_v4  ;;  %v1517_v24 = vadd.f32 %v4877_v44, %v3211_v5  ;;  %v1522_v25 = vadd.f32 %v3211_v5, %v4883_v29  ;;  %v1527_v21 = vadd.f32 %v4881_v46, %v3211_v5  ;;  %v1532_v31 = vadd.f32 %v3211_v5, %v4887_v38  ;;  %v2146_v38 = vld [vmem:[%s5200_s17] sm:$0xff] }
 0x538   :  { %4074 = vmatpush3.bf16.msra.mxu0 %v4071_v4  ;;  %v1537_v50 = vadd.f32 %v4885_v52, %v3211_v5  ;;  %v4075_v54 = vpack.c.bf16 %v2147_v28, %v2146_v38  ;;  %v31_v52 = vstv %s5201_s18 }
 0x539   :  { %1944 = vmatmul.mubr.f32.gmra.mrb[74].mxu1 %v4449_v6  ;;  %v1502_v6 = vadd.f32 %v3211_v5, %v4875_v32  ;;  %32 = vst [vmem:[#allocation2] sm:$0x1] %v31_v52 }
 0x53a   :  { %3255 = vmatprep.mubr.msk.f32.mxu1 %vm571_vm1, %v4454_v7  ;;  %4076 = vmatprep.subr.bf16.mxu0 %v4075_v54 }
 0x53d   :  { %1949 = vmatmul.mubr.f32.gmra.mrb[76].mxu1 %v4462_v8 }
 0x53e   :  { %3256 = vmatprep.mubr.msk.f32.mxu1 %vm571_vm1, %v4467_v9 }
 0x541   :  { %1954 = vmatmul.mubr.f32.gmra.mrb[78].mxu1 %v4475_v10  ;;  %v1507_v10 = vadd.f32 %v4873_v40, %v3211_v5 }
 0x542   :  { %3257 = vmatprep.mubr.msk.f32.mxu1 %vm571_vm1, %v4480_v11 }
 0x545   :  { %1959 = vmatmul.mubr.f32.gmra.mrb[80].mxu1 %v4488_v12 }
 0x546   :  { %3258 = vmatprep.mubr.msk.f32.mxu1 %vm571_vm1, %v4493_v13 }
 0x549   :  { %1964 = vmatmul.mubr.f32.gmra.mrb[82].mxu1 %v4501_v14  ;;  %v1512_v14 = vadd.f32 %v3211_v5, %v4879_v45 }
 0x54a   :  { %3259 = vmatprep.mubr.msk.f32.mxu1 %vm571_vm1, %v4506_v15 }
 0x54d   :  { %1969 = vmatmul.mubr.f32.gmra.mrb[84].mxu1 %v4514_v16 }
 0x604   :  { %v1935_v7 = vpop.f32.mrb[70].mxu1 }
 0x605   :  { %v4932_v8 = vadd.f32 %v1935_v7, %v1502_v6  ;;  %v1937_v9 = vpop.f32.mrb[71].mxu1 }
 0x607   :  { %3758 = vmatprep.mubr.msk.f32.mxu0 %vm774_vm3, %v4932_v8 }
 0x608   :  { %v1940_v11 = vpop.f32.mrb[72].mxu1 }
 0x609   :  { %v4937_v12 = vadd.f32 %v1940_v11, %v1507_v10  ;;  %v1942_v13 = vpop.f32.mrb[73].mxu1 }
 0x60b   :  { %3759 = vmatmul.mubr.msk.f32.vlgmr.msra.gmra.mrb[58].mxu0 %vm774_vm3, %v4937_v12 }
 0x60c   :  { %v1945_v15 = vpop.f32.mrb[74].mxu1  ;;  %4078 = vmatpush3.bf16.msra.mxu0 %v4075_v54 }
 0x60d   :  { %v4942_v16 = vadd.f32 %v1945_v15, %v1512_v14  ;;  %v1947_v22 = vpop.f32.mrb[75].mxu1  ;;  %4079 = vmatprep.subr.bf16.mxu0 %v4165_v20  ;;  %v4166_v14 = vmov 0  }
 0x60e   :  { %4130 = vset.pattern.permute.xlu1 %v4166_v14  ;;  %4129 = vset.pattern.permute.xlu0 %v4166_v14 }
 0x60f   :  { %3761 = vmatprep.mubr.msk.f32.mxu0 %vm774_vm3, %v4942_v16 }
 0x610   :  { %v1950_v33 = vpop.f32.mrb[76].mxu1 }
 0x611   :  { %v4947_v37 = vadd.f32 %v1950_v33, %v1517_v24  ;;  %v1952_v40 = vpop.f32.mrb[77].mxu1 }
 0x612   :  { %v3269_v40 = vld [vmem:[#allocation2] ss:$0 sm:$0xff] }
 0x613   :  { %3762 = vmatmul.mubr.msk.f32.gmra.mrb[60].mxu0 %vm774_vm3, %v4947_v37 }
 0x614   :  { %v1955_v32 = vpop.f32.mrb[78].mxu1 }
 0x615   :  { %v4952_v41 = vadd.f32 %v1955_v32, %v1522_v25  ;;  %v1957_v43 = vpop.f32.mrb[79].mxu1 }
 0x617   :  { %3764 = vmatprep.mubr.msk.f32.mxu0 %vm774_vm3, %v4952_v41 }
 0x618   :  { %v1960_v44 = vpop.f32.mrb[80].mxu1 }
 0x619   :  { %v4957_v45 = vadd.f32 %v1960_v44, %v1527_v21  ;;  %v1962_v23 = vpop.f32.mrb[81].mxu1 }
 0x61b   :  { %3765 = vmatmul.mubr.msk.f32.gmra.mrb[62].mxu0 %vm774_vm3, %v4957_v45 }
 0x61c   :  { %v1965_v49 = vpop.f32.mrb[82].mxu1 }
 0x61d   :  { %v4962_v29 = vadd.f32 %v1965_v49, %v1532_v31  ;;  %v1967_v47 = vpop.f32.mrb[83].mxu1 }
 0x61f   :  { %3767 = vmatprep.mubr.msk.f32.mxu0 %vm774_vm3, %v4962_v29 }
 0x620   :  { %v1970_v46 = vpop.f32.mrb[84].mxu1 }
 0x621   :  { %v4967_v53 = vadd.f32 %v1970_v46, %v1537_v50  ;;  %v1972_v55 = vpop.f32.mrb[85].mxu1 }
 0x623   :  { %3768 = vmatmul.mubr.msk.f32.gmra.mrb[64].mxu0 %vm774_vm3, %v4967_v53 }
 0x6de   :  { %v3760_v56 = vpop.f32.mrb[58].mxu0 }
 0x6df   :  { %v2089_v57 = vadd.f32 %v3760_v56, %v3260_v27  ;;  %v2083_v58 = vpop.f32.mrb[59].mxu0 }
 0x6e0   :  { %v2084_v59 = vadd.f32 %v3260_v27, %v2083_v58 }
 0x6e1   :  { %v2131_v60 = vmul.f32 0.1, %v2089_v57  ;;  %vm2123_vm6 = vcmp.ge.f32.partialorder %v2089_v57, 0.0 }
 0x6e2   :  { %vm2122_vm7 = vcmp.ge.f32.partialorder %v2084_v59, 0.0  ;;  %v2130_v61 = vmul.f32 0.1, %v2084_v59 }
 0x6e3   :  { %v2139_v34 = vsel %vm2123_vm6, %v2089_v57, %v2131_v60 }
 0x6e4   :  { %v2138_v36 = vsel %vm2122_vm7, %v2084_v59, %v2130_v61 }
 0x6e5   :  { %3774 = vmatprep.mubr.msk.f32.mxu0 %vm118_vm0, %v2138_v36 }
 0x6e6   :  { %v3763_v35 = vpop.f32.mrb[60].mxu0  ;;  %3775 = vmatmul.mubr.msk.f32.vlgmr.msra.gmra.mrb[66].mxu0 %vm118_vm0, %v2139_v34 }
 0x6e7   :  { %v2099_v62 = vadd.f32 %v3763_v35, %v3260_v27  ;;  %v2093_v63 = vpop.f32.mrb[61].mxu0 }
 0x6e8   :  { %v2094_v39 = vadd.f32 %v3260_v27, %v2093_v63 }
 0x6e9   :  { %v2133_v0 = vmul.f32 0.1, %v2099_v62  ;;  %vm2125_vm8 = vcmp.ge.f32.partialorder %v2099_v62, 0.0 }
 0x6ea   :  { %vm2124_vm9 = vcmp.ge.f32.partialorder %v2094_v39, 0.0  ;;  %v2132_v42 = vmul.f32 0.1, %v2094_v39 }
 0x6eb   :  { %v2141_v26 = vsel %vm2125_vm8, %v2099_v62, %v2133_v0 }
 0x6ec   :  { %v2140_v1 = vsel %vm2124_vm9, %v2094_v39, %v2132_v42 }
 0x6ed   :  { %3777 = vmatprep.mubr.msk.f32.mxu0 %vm118_vm0, %v2140_v1 }
 0x6ee   :  { %v3766_v30 = vpop.f32.mrb[62].mxu0  ;;  %3778 = vmatmul.mubr.msk.f32.gmra.mrb[68].mxu0 %vm118_vm0, %v2141_v26 }
 0x6ef   :  { %v2109_v48 = vadd.f32 %v3766_v30, %v3260_v27  ;;  %v2103_v17 = vpop.f32.mrb[63].mxu0 }
 0x6f0   :  { %v2104_v18 = vadd.f32 %v3260_v27, %v2103_v17 }
 0x6f1   :  { %v2135_v19 = vmul.f32 0.1, %v2109_v48  ;;  %vm2127_vm10 = vcmp.ge.f32.partialorder %v2109_v48, 0.0 }
 0x6f2   :  { %vm2126_vm11 = vcmp.ge.f32.partialorder %v2104_v18, 0.0  ;;  %v2134_v51 = vmul.f32 0.1, %v2104_v18 }
 0x6f3   :  { %v2143_v3 = vsel %vm2127_vm10, %v2109_v48, %v2135_v19 }
 0x6f4   :  { %v2142_v2 = vsel %vm2126_vm11, %v2104_v18, %v2134_v51 }
 0x6f5   :  { %3780 = vmatprep.mubr.msk.f32.mxu0 %vm118_vm0, %v2142_v2 }
 0x6f6   :  { %v3769_v4 = vpop.f32.mrb[64].mxu0  ;;  %3781 = vmatmul.mubr.msk.f32.gmra.mrb[70].mxu0 %vm118_vm0, %v2143_v3 }
 0x6f7   :  { %v2119_v5 = vadd.f32 %v3769_v4, %v3260_v27  ;;  %v2113_v6 = vpop.f32.mrb[65].mxu0 }
 0x6f8   :  { %v2114_v7 = vadd.f32 %v3260_v27, %v2113_v6 }
 0x6f9   :  { %v2137_v9 = vmul.f32 0.1, %v2119_v5  ;;  %vm2129_vm12 = vcmp.ge.f32.partialorder %v2119_v5, 0.0 }
 0x6fa   :  { %vm2128_vm13 = vcmp.ge.f32.partialorder %v2114_v7, 0.0  ;;  %v2136_v10 = vmul.f32 0.1, %v2114_v7 }
 0x6fb   :  { %v2145_v13 = vsel %vm2129_vm12, %v2119_v5, %v2137_v9 }
 0x6fc   :  { %v2144_v11 = vsel %vm2128_vm13, %v2114_v7, %v2136_v10 }
 0x6fd   :  { %3783 = vmatprep.mubr.msk.f32.mxu0 %vm118_vm0, %v2144_v11 }
 0x6fe   :  { %3784 = vmatmul.mubr.msk.f32.gmra.mrb[72].mxu0 %vm118_vm0, %v2145_v13 }
 0x7b9   :  { %v3776_v15 = vpop.f32.mrb[66].mxu0 }
 0x7ba   :  { %v2245_v22 = vpop.f32.mrb[67].mxu0  ;;  %v2251_v25 = vadd.f32 %v3776_v15, %v3269_v40 }
 0x7bb   :  { %v2246_v32 = vadd.f32 %v3269_v40, %v2245_v22 }
 0x7bc   :  { %v2286_v31 = vsel %vm2284_vm14, %v2251_v25, -inf }
 0x7bd   :  { %v2285_v47 = vsel %vm2284_vm14, %v2246_v32, -inf }
 0x7c1   :  { %v3779_v24 = vpop.f32.mrb[68].mxu0 }
 0x7c2   :  { %v2255_v33 = vpop.f32.mrb[69].mxu0  ;;  %v2261_v38 = vadd.f32 %v3779_v24, %v3269_v40 }
 0x7c3   :  { %v2256_v54 = vadd.f32 %v3269_v40, %v2255_v33 }
 0x7c4   :  { %v2288_v58 = vsel %vm2284_vm14, %v2261_v38, -inf }
 0x7c5   :  { %v2287_v60 = vsel %vm2284_vm14, %v2256_v54, -inf }
 0x7c9   :  { %v3782_v43 = vpop.f32.mrb[70].mxu0 }
 0x7ca   :  { %v2271_v21 = vadd.f32 %v3782_v43, %v3269_v40  ;;  %v2265_v44 = vpop.f32.mrb[71].mxu0 }
 0x7cb   :  { %v2266_v23 = vadd.f32 %v3269_v40, %v2265_v44 }
 0x7cc   :  { %v2291_v49 = vsel %vm2284_vm14, %v2271_v21, -inf }
 0x7cd   :  { %v2292_v50 = vmax.f32 %v2286_v31, %v2291_v49  ;;  %v2289_v46 = vsel %vm2284_vm14, %v2266_v23, -inf }
 0x7ce   :  { %v2290_v55 = vmax.f32 %v2285_v47, %v2289_v46 }
 0x7d0   :  { %v2297_v28 = vmax.f32 %v2290_v55, %v2292_v50 }
 0x7d1   :  { %v3785_v52 = vpop.f32.mrb[72].mxu0 }
 0x7d2   :  { %v2281_v27 = vadd.f32 %v3785_v52, %v3269_v40  ;;  %v2275_v56 = vpop.f32.mrb[73].mxu0 }
 0x7d3   :  { %v2276_v57 = vadd.f32 %v3269_v40, %v2275_v56 }
 0x7d4   :  { %v2295_v59 = vsel %vm2284_vm14, %v2281_v27, -inf }
 0x7d5   :  { %v2296_v61 = vmax.f32 %v2288_v58, %v2295_v59  ;;  %v2293_v36 = vsel %vm2284_vm14, %v2276_v57, -inf }
 0x7d6   :  { %v2294_v34 = vmax.f32 %v2287_v60, %v2293_v36 }
 0x7d8   :  { %v2298_v35 = vmax.f32 %v2294_v34, %v2296_v61 }
 0x7da   :  { %v2299_v62 = vmax.f32 %v2297_v28, %v2298_v35 }
 0x7dc   :  { %v2300_v63 = vrot.slane %v2299_v62, 4 }
 0x7de   :  { %v2301_v39 = vmax.f32 %v2299_v62, %v2300_v63 }
 0x7e0   :  { %v2302_v0 = vrot.slane %v2301_v39, 2 }
 0x7e2   :  { %v2303_v42 = vmax.f32 %v2301_v39, %v2302_v0 }
 0x7e4   :  { %v2304_v1 = vrot.slane %v2303_v42, 1 }
 0x7e6   :  { %v2305_v26 = vmax.f32 %v2303_v42, %v2304_v1 }
 0x7e8   :  { %v2312_v30 = vsub.f32 %v2276_v57, %v2305_v26  ;;  %v2313_v48 = vsub.f32 %v2281_v27, %v2305_v26  ;;  %v2306_v17 = vsub.f32 %v2246_v32, %v2305_v26  ;;  %v2307_v18 = vsub.f32 %v2251_v25, %v2305_v26 }
 0x7e9   :  { %v2308_v19 = vsub.f32 %v2256_v54, %v2305_v26  ;;  %v2309_v51 = vsub.f32 %v2261_v38, %v2305_v26  ;;  %v2310_v2 = vsub.f32 %v2266_v23, %v2305_v26  ;;  %v2311_v3 = vsub.f32 %v2271_v21, %v2305_v26 }
 0x7ea   :  { %v2314_v4 = vmul.f32 1.442695, %v2306_v17  ;;  %v2316_v5 = vmul.f32 1.442695, %v2307_v18  ;;  %v2326_v11 = vmul.f32 1.442695, %v2312_v30 }
 0x7eb   :  { %v2318_v6 = vmul.f32 1.442695, %v2308_v19  ;;  %v2320_v7 = vmul.f32 1.442695, %v2309_v51  ;;  %v2322_v9 = vmul.f32 1.442695, %v2310_v2 }
 0x7ec   :  { %4131 = vpow2.f32 %v2314_v4  ;;  %v2324_v10 = vmul.f32 1.442695, %v2311_v3  ;;  %v2328_v13 = vmul.f32 1.442695, %v2313_v48  ;;  %v4168_v26 = vmov 0.0  }
 0x7ed   :  { %4133 = vpow2.f32 %v2316_v5  ;;  %3802 = vmatprep.mubr.msk.f32.mxu0 %vm4167_vm15, %v4168_v26 }
 0x7ee   :  { %4135 = vpow2.f32 %v2318_v6 }
 0x7ef   :  { %4137 = vpow2.f32 %v2320_v7 }
 0x7f0   :  { %4139 = vpow2.f32 %v2322_v9 }
 0x7f1   :  { %4141 = vpow2.f32 %v2324_v10 }
 0x7f2   :  { %4143 = vpow2.f32 %v2326_v11 }
 0x7f3   :  { %4145 = vpow2.f32 %v2328_v13 }
 0x7f6   :  { %v4132_v14 = vpop.eup %4131 }
 0x7f7   :  { %v4134_v15 = vpop.eup %4133  ;;  %v2330_v22 = vsel %vm2284_vm14, %v4132_v14, 0.0 }
 0x7f8   :  { %v4136_v24 = vpop.eup %4135  ;;  %v2331_v33 = vsel %vm2284_vm14, %v4134_v15, 0.0 }
 0x7f9   :  { %v4138_v40 = vpop.eup %4137  ;;  %v2332_v25 = vadd.f32 %v2331_v33, %v2330_v22  ;;  %v2333_v32 = vsel %vm2284_vm14, %v4136_v24, 0.0  ;;  %v2408_v33 = vld [vmem:[%s5203_s19] sm:$0x3] }
 0x7fa   :  { %v4140_v43 = vpop.eup %4139  ;;  %v2335_v44 = vsel %vm2284_vm14, %v4138_v40, 0.0 }
 0x7fb   :  { %v2334_v21 = vadd.f32 %v2333_v32, %v2332_v25  ;;  %v4142_v23 = vpop.eup %4141  ;;  %v2337_v49 = vsel %vm2284_vm14, %v4140_v43, 0.0  ;;  %v2628_v25 = vld [vmem:[%s5205_s22] sm:$0xff]  ;;  %v2630_v32 = vld [vmem:[%s5205_s22 + $0x10] sm:$0xff] }
 0x7fc   :  { %v4144_v47 = vpop.eup %4143  ;;  %v2339_v46 = vsel %vm2284_vm14, %v4142_v23, 0.0 }
 0x7fd   :  { %v2336_v31 = vadd.f32 %v2335_v44, %v2334_v21  ;;  %v4146_v55 = vpop.eup %4145  ;;  %v2341_v28 = vsel %vm2284_vm14, %v4144_v47, 0.0  ;;  %v2631_v21 = vld [vmem:[%s5205_s22 + $0x18] sm:$0xff] }
 0x7fe   :  { %v2343_v52 = vsel %vm2284_vm14, %v4146_v55, 0.0  ;;  %v4095_v44 = vpack.c.bf16 %v2631_v21, %v2630_v32  ;;  %v3305_v21 = vld [vmem:[%s5209_s25] ss:$0 sm:$0xff] }
 0x7ff   :  { %v2338_v50 = vadd.f32 %v2337_v49, %v2336_v31  ;;  %v2483_v31 = vld [vmem:[%s5204_s20 + $0x8] sm:$0xff] }
 0x801   :  { %v2340_v38 = vadd.f32 %v2339_v46, %v2338_v50  ;;  %v2485_v50 = vld [vmem:[%s5204_s20 + $0x18] sm:$0xff]  ;;  %v2486_v46 = vld [vmem:[%s5204_s20 + $0x20] sm:$0xff] }
 0x803   :  { %v2342_v54 = vadd.f32 %v2341_v28, %v2340_v38  ;;  %v2488_v38 = vld [vmem:[%s5204_s20 + $0x30] sm:$0xff]  ;;  %v2489_v28 = vld [vmem:[%s5204_s20 + $0x38] sm:$0xff] }
 0x805   :  { %v2344_v27 = vadd.f32 %v2343_v52, %v2342_v54  ;;  %v2624_v54 = vld [vmem:[%s5206_s21] sm:$0xff]  ;;  %v2625_v52 = vld [vmem:[%s5206_s21 + $0x8] sm:$0xff] }
 0x807   :  { %v2345_v56 = vrot.slane %v2344_v27, 4 }
 0x809   :  { %v2346_v57 = vadd.f32 %v2345_v56, %v2344_v27  ;;  %v4099_v27 = vpack.c.bf16 %v2625_v52, %v2624_v54  ;;  %v2905_v56 = vld [vmem:[%s5207_s24] sm:$0xff] }
 0x80b   :  { %v2347_v58 = vrot.slane %v2346_v57, 2 }
 0x80d   :  { %v2348_v59 = vadd.f32 %v2347_v58, %v2346_v57  ;;  %v2906_v57 = vld [vmem:[%s5207_s24 + $0x8] sm:$0xff] }
 0x80e   :  { %v4107_v58 = vpack.c.bf16 %v2906_v57, %v2905_v56 }
 0x80f   :  { %v2349_v60 = vrot.slane %v2348_v59, 1 }
 0x811   :  { %v2350_v61 = vadd.f32 %v2349_v60, %v2348_v59  ;;  %v2626_v59 = vld [vmem:[%s5206_s21 + $0x10] sm:$0xff]  ;;  %v2627_v60 = vld [vmem:[%s5206_s21 + $0x18] sm:$0xff] }
 0x813   :  { %4147 = vrcp.f32 %v2350_v61 }
 0x81d   :  { %v4148_v36 = vpop.eup %4147 }
 0x81e   :  { %v2354_v34 = vmul.f32 %v4148_v36, %v4136_v24  ;;  %v2352_v35 = vmul.f32 %v4148_v36, %v4132_v14  ;;  %v2355_v62 = vmul.f32 %v4148_v36, %v4138_v40  ;;  %v2353_v63 = vmul.f32 %v4148_v36, %v4134_v15  ;;  %v2482_v40 = vld [vmem:[%s5204_s20] sm:$0xff] }
 0x81f   :  { %v2357_v39 = vmul.f32 %v4148_v36, %v4142_v23  ;;  %v2356_v0 = vmul.f32 %v4148_v36, %v4140_v43  ;;  %v2359_v42 = vmul.f32 %v4148_v36, %v4146_v55  ;;  %v2358_v1 = vmul.f32 %v4148_v36, %v4144_v47  ;;  %v2484_v47 = vld [vmem:[%s5204_s20 + $0x10] sm:$0xff]  ;;  %v2487_v55 = vld [vmem:[%s5204_s20 + $0x28] sm:$0xff] }
 0x820   :  { %2372 = vperm.xlu1 %4130, %v2354_v34   ;;  %2362 = vperm.xlu0 %4129, %v2352_v35   ;;  %v4103_v34 = vpack.c.bf16 %v2627_v60, %v2626_v59 }
 0x824   :  { %2377 = vperm.xlu1 %4130, %v2355_v62   ;;  %2367 = vperm.xlu0 %4129, %v2353_v63  }
 0x828   :  { %2387 = vperm.xlu1 %4130, %v2357_v39   ;;  %2382 = vperm.xlu0 %4129, %v2356_v0  }
 0x82c   :  { %2397 = vperm.xlu1 %4130, %v2359_v42   ;;  %2392 = vperm.xlu0 %4129, %v2358_v1  }
 0x89f   :  { %v2373_v30 = vpop.permute.xlu1 %2372  ;;  %v2363_v48 = vpop.permute.xlu0 %2362 }
 0x8a0   :  { %v2400_v19 = vmul.f32 %v2363_v48, %v4932_v8  ;;  %v2402_v6 = vmul.f32 %v2373_v30, %v4942_v16 }
 0x8a3   :  { %v2378_v17 = vpop.permute.xlu1 %2377  ;;  %v2368_v18 = vpop.permute.xlu0 %2367 }
 0x8a4   :  { %v2401_v51 = vmul.f32 %v2368_v18, %v4937_v12  ;;  %v2403_v2 = vmul.f32 %v2378_v17, %v4947_v37 }
 0x8a6   :  { %v4080_v3 = vpack.c.bf16 %v2401_v51, %v2400_v19  ;;  %v4083_v7 = vpack.c.bf16 %v2403_v2, %v2402_v6 }
 0x8a7   :  { %v2388_v4 = vpop.permute.xlu1 %2387  ;;  %v2383_v5 = vpop.permute.xlu0 %2382 }
 0x8a8   :  { %4081 = vmatpush3.bf16.msra.mxu0 %v4080_v3  ;;  %v2405_v9 = vmul.f32 %v2388_v4, %v4957_v45  ;;  %v2404_v10 = vmul.f32 %v2383_v5, %v4952_v41 }
 0x8a9   :  { %4082 = vmatprep.subr.bf16.mxu0 %v4165_v20 }
 0x8aa   :  { %v4086_v14 = vpack.c.bf16 %v2405_v9, %v2404_v10 }
 0x8ab   :  { %v2398_v11 = vpop.permute.xlu1 %2397  ;;  %v2393_v13 = vpop.permute.xlu0 %2392 }
 0x8ac   :  { %4084 = vmatpush3.bf16.msra.mxu0 %v4083_v7  ;;  %v2407_v15 = vmul.f32 %v2398_v11, %v4967_v53  ;;  %v2406_v22 = vmul.f32 %v2393_v13, %v4962_v29 }
 0x8ad   :  { %4085 = vmatprep.subr.bf16.mxu0 %v4165_v20 }
 0x8ae   :  { %v4089_v24 = vpack.c.bf16 %v2407_v15, %v2406_v22 }
 0x8b0   :  { %4087 = vmatpush3.bf16.msra.mxu0 %v4086_v14 }
 0x8b1   :  { %4088 = vmatprep.subr.bf16.mxu0 %v4165_v20  ;;  %v2629_v20 = vld [vmem:[%s5205_s22 + $0x8] sm:$0xff] }
 0x8b2   :  { %v4091_v43 = vpack.c.bf16 %v2629_v20, %v2628_v25 }
 0x8b4   :  { %4090 = vmatpush3.bf16.msra.mxu0 %v4089_v24  ;;  %4092 = vmatprep.subr.bf16.mxu1 %v4091_v43 }
 0x8b5   :  { %4094 = vmatpush3.bf16.msra.mxu1 %v4091_v43 }
 0x8b6   :  { %4096 = vmatprep.subr.bf16.mxu1 %v4095_v44 }
 0x8b7   :  { %3803 = vmatmul.mubr.msk.f32.vlgmr.msra.gmra.mrb[74].mxu0 %vm571_vm1, %v2408_v33  ;;  %vm2515_vm1 = vcmask 1041408  }
 0x8b8   :  { %3807 = vmatprep.mubr.msk.f32.mxu0 %vm2490_vm2, %v2482_v40 }
 0x8b9   :  { %4098 = vmatpush3.bf16.msra.mxu1 %v4095_v44 }
 0x8ba   :  { %4100 = vmatprep.subr.bf16.mxu1 %v4099_v27 }
 0x98a   :  { %v2478_v23 = vpop.f32.mrb[74].mxu0 }
 0x98b   :  { %v3804_v49 = vpop.f32.mrb[75].mxu0  ;;  %3805 = vmatprep.subr.msk.mxu0 %vm2515_vm1, %v2478_v23 }
 0x98c   :  { %3806 = vmatpush3.msk.msra.mxu0 %vm2515_vm1, %v2478_v23 }
 0x98d   :  { %3808 = vmatmul.mubr.msk.f32.vlgmr.msra.gmra.mrb[76].mxu0 %vm2490_vm2, %v2483_v31  ;;  %4108 = vmatprep.subr.bf16.mxu0 %v4107_v58 }
 0x98e   :  { %3810 = vmatprep.mubr.msk.f32.mxu0 %vm2490_vm2, %v2484_v47  ;;  %4110 = vmatpush3.bf16.msra.mxu0 %v4107_v58 }
 0x991   :  { %3811 = vmatmul.mubr.msk.f32.gmra.mrb[78].mxu0 %vm2490_vm2, %v2485_v50 }
 0x992   :  { %3813 = vmatprep.mubr.msk.f32.mxu0 %vm2490_vm2, %v2486_v46 }
 0x995   :  { %3814 = vmatmul.mubr.msk.f32.gmra.mrb[80].mxu0 %vm2490_vm2, %v2487_v55 }
 0x996   :  { %3816 = vmatprep.mubr.msk.f32.mxu0 %vm2490_vm2, %v2488_v38 }
 0x999   :  { %3817 = vmatmul.mubr.msk.f32.gmra.mrb[82].mxu0 %vm2490_vm2, %v2489_v28 }
 0xa60   :  { %v3809_v61 = vpop.f32.mrb[76].mxu0 }
 0xa61   :  { %v2585_v36 = vpop.f32.mrb[77].mxu0 }
 0xa62   :  { %3827 = vmatprep.mubr.msk.f32.mxu1 %vm774_vm3, %v2585_v36 }
 0xa63   :  { %3828 = vmatmul.mubr.msk.f32.vlgmr.msra.gmra.mrb[86].mxu1 %vm774_vm3, %v3809_v61 }
 0xa64   :  { %v3812_v35 = vpop.f32.mrb[78].mxu0  ;;  %4102 = vmatpush3.bf16.msra.mxu1 %v4099_v27 }
 0xa65   :  { %v2595_v62 = vpop.f32.mrb[79].mxu0  ;;  %4104 = vmatprep.subr.bf16.mxu1 %v4103_v34 }
 0xa66   :  { %3830 = vmatprep.mubr.msk.f32.mxu1 %vm774_vm3, %v2595_v62 }
 0xa67   :  { %3831 = vmatmul.mubr.msk.f32.gmra.mrb[88].mxu1 %vm774_vm3, %v3812_v35 }
 0xa68   :  { %v3815_v63 = vpop.f32.mrb[80].mxu0  ;;  %4106 = vmatpush3.bf16.msra.mxu1 %v4103_v34 }
 0xa69   :  { %v2605_v39 = vpop.f32.mrb[81].mxu0 }
 0xa6a   :  { %3833 = vmatprep.mubr.msk.f32.mxu1 %vm774_vm3, %v2605_v39 }
 0xa6b   :  { %3834 = vmatmul.mubr.msk.f32.gmra.mrb[90].mxu1 %vm774_vm3, %v3815_v63 }
 0xa6c   :  { %v3818_v0 = vpop.f32.mrb[82].mxu0 }
 0xa6d   :  { %v2615_v42 = vpop.f32.mrb[83].mxu0 }
 0xa6e   :  { %3836 = vmatprep.mubr.msk.f32.mxu1 %vm774_vm3, %v2615_v42 }
 0xa6f   :  { %3837 = vmatmul.mubr.msk.f32.gmra.mrb[92].mxu1 %vm774_vm3, %v3818_v0 }
 0xa70   :  { %3847 = vmatprep.mubr.msk.f32.mxu1 %vm774_vm3, %v4932_v8  ;;  %v2907_v8 = vld [vmem:[%s5207_s24 + $0x10] sm:$0xff] }
 0xa73   :  { %3848 = vmatmul.mubr.msk.f32.vlgmr.msra.gmra.mrb[86].mxu1 %vm774_vm3, %v4937_v12  ;;  %v2908_v12 = vld [vmem:[%s5207_s24 + $0x18] sm:$0xff] }
 0xa74   :  { %3850 = vmatprep.mubr.msk.f32.mxu1 %vm774_vm3, %v4942_v16  ;;  %v4111_v16 = vpack.c.bf16 %v2908_v12, %v2907_v8 }
 0xa76   :  { %4112 = vmatprep.subr.bf16.mxu0 %v4111_v16 }
 0xa77   :  { %3851 = vmatmul.mubr.msk.f32.gmra.mrb[88].mxu1 %vm774_vm3, %v4947_v37  ;;  %4114 = vmatpush3.bf16.msra.mxu0 %v4111_v16  ;;  %v3304_v37 = vld [vmem:[%s5208_s23] ss:$0 sm:$0xff] }
 0xa78   :  { %3853 = vmatprep.mubr.msk.f32.mxu1 %vm774_vm3, %v4952_v41 }
 0xa7b   :  { %3854 = vmatmul.mubr.msk.f32.gmra.mrb[90].mxu1 %vm774_vm3, %v4957_v45 }
 0xa7c   :  { %3856 = vmatprep.mubr.msk.f32.mxu1 %vm774_vm3, %v4962_v29 }
 0xa7f   :  { %3857 = vmatmul.mubr.msk.f32.gmra.mrb[92].mxu1 %vm774_vm3, %v4967_v53 }
 0xb46   :  { %v3849_v41 = vpop.f32.mrb[86].mxu1 }
 0xb47   :  { %v2874_v45 = vadd.f32 %v3849_v41, %v3304_v37  ;;  %v2827_v29 = vpop.f32.mrb[87].mxu1 }
 0xb48   :  { %v2873_v1 = vadd.f32 %v3304_v37, %v2827_v29 }
 0xb49   :  { %v2890_v53 = vmul.f32 0.1, %v2874_v45  ;;  %vm2882_vm4 = vcmp.ge.f32.partialorder %v2874_v45, 0.0 }
 0xb4a   :  { %vm2881_vm5 = vcmp.ge.f32.partialorder %v2873_v1, 0.0  ;;  %v2889_v26 = vmul.f32 0.1, %v2873_v1  ;;  %v3852_v30 = vpop.f32.mrb[88].mxu1 }
 0xb4b   :  { %v2876_v48 = vadd.f32 %v3852_v30, %v3304_v37  ;;  %v2837_v17 = vpop.f32.mrb[89].mxu1  ;;  %v2898_v51 = vsel %vm2882_vm4, %v2874_v45, %v2890_v53 }
 0xb4c   :  { %v2875_v18 = vadd.f32 %v3304_v37, %v2837_v17  ;;  %v2897_v19 = vsel %vm2881_vm5, %v2873_v1, %v2889_v26 }
 0xb4d   :  { %v2892_v2 = vmul.f32 0.1, %v2876_v48  ;;  %3867 = vmatprep.mubr.msk.f32.mxu0 %vm774_vm3, %v2897_v19  ;;  %vm2884_vm6 = vcmp.ge.f32.partialorder %v2876_v48, 0.0 }
 0xb4e   :  { %vm2883_vm7 = vcmp.ge.f32.partialorder %v2875_v18, 0.0  ;;  %v2891_v3 = vmul.f32 0.1, %v2875_v18  ;;  %v3855_v4 = vpop.f32.mrb[90].mxu1  ;;  %3868 = vmatmul.mubr.msk.f32.vlgmr.msra.gmra.mrb[84].mxu0 %vm774_vm3, %v2898_v51 }
 0xb4f   :  { %v2878_v5 = vadd.f32 %v3855_v4, %v3304_v37  ;;  %v2847_v6 = vpop.f32.mrb[91].mxu1  ;;  %v2900_v11 = vsel %vm2884_vm6, %v2876_v48, %v2892_v2 }
 0xb50   :  { %v2877_v7 = vadd.f32 %v3304_v37, %v2847_v6  ;;  %v2899_v9 = vsel %vm2883_vm7, %v2875_v18, %v2891_v3 }
 0xb51   :  { %v2894_v10 = vmul.f32 0.1, %v2878_v5  ;;  %3870 = vmatprep.mubr.msk.f32.mxu0 %vm774_vm3, %v2899_v9  ;;  %vm2886_vm8 = vcmp.ge.f32.partialorder %v2878_v5, 0.0 }
 0xb52   :  { %vm2885_vm9 = vcmp.ge.f32.partialorder %v2877_v7, 0.0  ;;  %v2893_v13 = vmul.f32 0.1, %v2877_v7  ;;  %v3858_v14 = vpop.f32.mrb[92].mxu1  ;;  %3871 = vmatmul.mubr.msk.f32.gmra.mrb[86].mxu0 %vm774_vm3, %v2900_v11 }
 0xb53   :  { %v2880_v15 = vadd.f32 %v3858_v14, %v3304_v37  ;;  %v2857_v22 = vpop.f32.mrb[93].mxu1  ;;  %v2902_v25 = vsel %vm2886_vm8, %v2878_v5, %v2894_v10 }
 0xb54   :  { %v2879_v24 = vadd.f32 %v3304_v37, %v2857_v22  ;;  %v2901_v33 = vsel %vm2885_vm9, %v2877_v7, %v2893_v13 }
 0xb55   :  { %v2896_v40 = vmul.f32 0.1, %v2880_v15  ;;  %3873 = vmatprep.mubr.msk.f32.mxu0 %vm774_vm3, %v2901_v33  ;;  %vm2888_vm10 = vcmp.ge.f32.partialorder %v2880_v15, 0.0 }
 0xb56   :  { %vm2887_vm11 = vcmp.ge.f32.partialorder %v2879_v24, 0.0  ;;  %v2895_v20 = vmul.f32 0.1, %v2879_v24  ;;  %3874 = vmatmul.mubr.msk.f32.gmra.mrb[88].mxu0 %vm774_vm3, %v2902_v25 }
 0xb57   :  { %v2904_v43 = vsel %vm2888_vm10, %v2880_v15, %v2896_v40 }
 0xb58   :  { %v2903_v32 = vsel %vm2887_vm11, %v2879_v24, %v2895_v20 }
 0xb59   :  { %3876 = vmatprep.mubr.msk.f32.mxu0 %vm774_vm3, %v2903_v32 }
 0xb5a   :  { %3877 = vmatmul.mubr.msk.f32.gmra.mrb[90].mxu0 %vm774_vm3, %v2904_v43 }
 0xc21   :  { %v3869_v44 = vpop.f32.mrb[84].mxu0 }
 0xc22   :  { %v3012_v23 = vadd.f32 %v3869_v44, %v3305_v21  ;;  %v3006_v31 = vpop.f32.mrb[85].mxu0 }
 0xc23   :  { %v3007_v49 = vadd.f32 %v3305_v21, %v3006_v31 }
 0xc24   :  { %v3046_v47 = vmul.f32 %v3012_v23, %v3012_v23 }
 0xc25   :  { %v3872_v50 = vpop.f32.mrb[86].mxu0  ;;  %v3045_v46 = vmul.f32 %v3007_v49, %v3007_v49 }
 0xc26   :  { %v5129_v55 = vadd.f32 %v3872_v50, %v3305_v21  ;;  %v3016_v38 = vpop.f32.mrb[87].mxu0  ;;  %v3056_v28 = vsel %vm118_vm0, %v3046_v47, 0.0 }
 0xc27   :  { %v5132_v54 = vadd.f32 %v3305_v21, %v3016_v38  ;;  %3057 = vadd.xlane.f32.xlu1 %v3056_v28  ;;  %v3053_v52 = vsel %vm118_vm0, %v3045_v46, 0.0 }
 0xc28   :  { %3054 = vadd.xlane.f32.xlu0 %v3053_v52  ;;  %v3048_v27 = vmul.f32 %v5129_v55, %v5129_v55 }
 0xc29   :  { %v3875_v56 = vpop.f32.mrb[88].mxu0  ;;  %v3047_v59 = vmul.f32 %v5132_v54, %v5132_v54 }
 0xc2a   :  { %v3026_v57 = vpop.f32.mrb[89].mxu0  ;;  %v3062_v58 = vsel %vm118_vm0, %v3048_v27, 0.0  ;;  %v5140_v60 = vadd.f32 %v3875_v56, %v3305_v21 }
 0xc2b   :  { %v3027_v61 = vadd.f32 %v3305_v21, %v3026_v57  ;;  %v3059_v62 = vsel %vm118_vm0, %v3047_v59, 0.0 }
 0xc2c   :  { %3063 = vadd.xlane.f32.xlu0 %v3062_v58  ;;  %v3050_v42 = vmul.f32 %v5140_v60, %v5140_v60 }
 0xc2d   :  { %v3878_v36 = vpop.f32.mrb[90].mxu0  ;;  %v3049_v34 = vmul.f32 %v3027_v61, %v3027_v61 }
 0xc2e   :  { %v3036_v35 = vpop.f32.mrb[91].mxu0  ;;  %v3042_v63 = vadd.f32 %v3878_v36, %v3305_v21  ;;  %v3068_v12 = vsel %vm118_vm0, %v3050_v42, 0.0 }
 0xc2f   :  { %v3037_v39 = vadd.f32 %v3305_v21, %v3036_v35  ;;  %v3065_v0 = vsel %vm118_vm0, %v3049_v34, 0.0 }
 0xc30   :  { %3060 = vadd.xlane.f32.xlu0 %v3059_v62  ;;  %3066 = vadd.xlane.f32.xlu1 %v3065_v0  ;;  %v3052_v37 = vmul.f32 %v3042_v63, %v3042_v63 }
 0xc31   :  { %v3051_v8 = vmul.f32 %v3037_v39, %v3037_v39 }
 0xc32   :  { %v3074_v41 = vsel %vm118_vm0, %v3052_v37, 0.0 }
 0xc33   :  { %v3071_v16 = vsel %vm118_vm0, %v3051_v8, 0.0 }
 0xc34   :  { %3069 = vadd.xlane.f32.xlu0 %v3068_v12  ;;  %3072 = vadd.xlane.f32.xlu1 %v3071_v16 }
 0xc38   :  { %3075 = vadd.xlane.f32.xlu0 %v3074_v41 }
 0xcb4   :  { %v3058_v45 = vpop.xlane.xlu1 %3057 }
 0xcb5   :  { %v3078_v29 = vmax.f32 %v3058_v45, 1e-24  ;;  %v3055_v1 = vpop.xlane.xlu0 %3054 }
 0xcb6   :  { %v3077_v53 = vmax.f32 %v3055_v1, 1e-24 }
 0xcb7   :  { %4149 = vrsqrt.f32 %v3078_v29 }
 0xcb8   :  { %4151 = vrsqrt.f32 %v3077_v53 }
 0xcb9   :  { %v3064_v26 = vpop.xlane.xlu0 %3063 }
 0xcba   :  { %v3080_v30 = vmax.f32 %v3064_v26, 1e-24 }
 0xcbc   :  { %4153 = vrsqrt.f32 %v3080_v30 }
 0xcbd   :  { %v3061_v48 = vpop.xlane.xlu0 %3060  ;;  %v3067_v17 = vpop.xlane.xlu1 %3066 }
 0xcbe   :  { %v3079_v18 = vmax.f32 %v3061_v48, 1e-24  ;;  %v3081_v19 = vmax.f32 %v3067_v17, 1e-24 }
 0xcc0   :  { %4155 = vrsqrt.f32 %v3079_v18 }
 0xcc1   :  { %v4150_v51 = vpop.eup %4149  ;;  %4157 = vrsqrt.f32 %v3081_v19  ;;  %v3070_v2 = vpop.xlane.xlu0 %3069 }
 0xcc2   :  { %v3073_v3 = vpop.xlane.xlu1 %3072  ;;  %v4152_v4 = vpop.eup %4151  ;;  %v3094_v5 = vmul.f32 %v4150_v51, %v3012_v23  ;;  %v3082_v6 = vmax.f32 %v3070_v2, 1e-24 }
 0xcc3   :  { %v3083_v7 = vmax.f32 %v3073_v3, 1e-24  ;;  %v3093_v9 = vmul.f32 %v4152_v4, %v3007_v49 }
 0xcc4   :  { %3102 = vst.msk [vmem:[%s5210_s26 + $0x8] sm:$0xff] %vm118_vm0, %v3094_v5  ;;  %4159 = vrsqrt.f32 %v3082_v6 }
 0xcc5   :  { %3101 = vst.msk [vmem:[%s5210_s26] sm:$0xff] %vm118_vm0, %v3093_v9  ;;  %4161 = vrsqrt.f32 %v3083_v7  ;;  %v3076_v10 = vpop.xlane.xlu0 %3075 }
 0xcc6   :  { %v4154_v11 = vpop.eup %4153  ;;  %v3084_v13 = vmax.f32 %v3076_v10, 1e-24 }
 0xcc7   :  { %v3096_v14 = vmul.f32 %v4154_v11, %v5129_v55 }
 0xcc8   :  { %4163 = vrsqrt.f32 %v3084_v13 }
 0xcc9   :  { %3104 = vst.msk [vmem:[%s5210_s26 + $0x18] sm:$0xff] %vm118_vm0, %v3096_v14 }
 0xcca   :  { %v4156_v15 = vpop.eup %4155 }
 0xccb   :  { %v4158_v22 = vpop.eup %4157  ;;  %v3095_v24 = vmul.f32 %v4156_v15, %v5132_v54 }
 0xccc   :  { %v3097_v33 = vmul.f32 %v4158_v22, %v3027_v61 }
 0xccd   :  { %3103 = vst.msk [vmem:[%s5210_s26 + $0x10] sm:$0xff] %vm118_vm0, %v3095_v24 }
 0xcce   :  { %v4160_v40 = vpop.eup %4159  ;;  %3105 = vst.msk [vmem:[%s5210_s26 + $0x20] sm:$0xff] %vm118_vm0, %v3097_v33 }
 0xccf   :  { %v4162_v25 = vpop.eup %4161  ;;  %v3098_v20 = vmul.f32 %v4160_v40, %v5140_v60 }
 0xcd0   :  { %v3099_v32 = vmul.f32 %v4162_v25, %v3037_v39 }
 0xcd1   :  { %3106 = vst.msk [vmem:[%s5210_s26 + $0x28] sm:$0xff] %vm118_vm0, %v3098_v20 }
 0xcd2   :  { %v4164_v43 = vpop.eup %4163  ;;  %3107 = vst.msk [vmem:[%s5210_s26 + $0x30] sm:$0xff] %vm118_vm0, %v3099_v32 }
 0xcd3   :  { %v3100_v21 = vmul.f32 %v4164_v43, %v3042_v63 }
 0xcd5   :  { %3108 = vst.msk [vmem:[%s5210_s26 + $0x38] sm:$0xff] %vm118_vm0, %v3100_v21 }

</bundles_post_ra>
